<compile_context>
chip_gen: v7x
topology: tpu7x:2x2x1
jax: 0.10.0
libtpu: 0.0.40
codegen_flags: <defaults>
</compile_context>

<pallas_src>
import functools

import jax
import jax.numpy as jnp
from jax.experimental import pallas as pl
from jax.experimental.pallas import tpu as pltpu


def _round_up(x, m):
    return ((x + m - 1) // m) * m


# ------------------------- tiled linear (GEMM + bias) ------------------------

def _linear_kernel(x_ref, w_ref, b_ref, o_ref):
    # bf16 operands, f32 MXU accumulation, f32 bias add, cast on store.
    acc = jnp.dot(x_ref[...], w_ref[...], preferred_element_type=jnp.float32)
    o_ref[...] = (acc + b_ref[...]).astype(o_ref.dtype)


def linear_pallas(x, w_t, b_row, *, tm=512, tn=512):
    """x: (M, K) bf16 (M % 8 == 0), w_t: (K, N) bf16, b_row: (1, N) f32."""
    M, K = x.shape
    N = w_t.shape[1]
    tm = min(tm, M)
    tn = min(tn, N)
    Mp = _round_up(M, tm)
    Np = _round_up(N, tn)
    if Mp != M:
        x = jnp.pad(x, ((0, Mp - M), (0, 0)))
    if Np != N:
        w_t = jnp.pad(w_t, ((0, 0), (0, Np - N)))
        b_row = jnp.pad(b_row, ((0, 0), (0, Np - N)))

    out = pl.pallas_call(
        _linear_kernel,
        out_shape=jax.ShapeDtypeStruct((Mp, Np), jnp.float32),
        grid_spec=pltpu.PrefetchScalarGridSpec(
            num_scalar_prefetch=0,
            grid=(Mp // tm, Np // tn),
            in_specs=[
                pl.BlockSpec((tm, K), lambda i, j: (i, 0)),
                pl.BlockSpec((K, tn), lambda i, j: (0, j)),
                pl.BlockSpec((1, tn), lambda i, j: (0, j)),
            ],
            out_specs=pl.BlockSpec((tm, tn), lambda i, j: (i, j)),
        ),
        compiler_params=pltpu.CompilerParams(
            dimension_semantics=("parallel", "parallel")),
    )(x, w_t, b_row)
    return out[:M, :N]


# -------------------- fused input-proj + LSTM recurrence ---------------------

def _lstm_chunk_kernel(x_ref, wih_ref, whh_ref, b_ref, h0_ref, c0_ref,
                       out_ref, hn_ref, cn_ref, h_s, c_s, xp_s,
                       *, seq_len, unroll):
    """One chunk of time steps.  Grid = (num_chunks,), serial ("arbitrary").

    x_ref  : (chunk*Bp, Hp) bf16  time-major-flattened layer input for this chunk
    wih_ref: (Hp, 4*Hp)     bf16  W_ih^T (gate-block lane-padded)
    whh_ref: (Hp, 4*Hp)     bf16  W_hh^T (gate-block lane-padded)
    b_ref  : (1, 4*Hp)      f32   b_ih + b_hh
    out_ref: (chunk, Bp, Hp) bf16 per-step hidden (next layer's input slab)
    h_s/c_s: (Bp, Hp) f32 VMEM scratch state, persistent across grid steps
    xp_s   : (chunk*Bp, 4*Hp) f32 VMEM scratch for the hoisted input projection
    """
    chunk, Bp, Hp = out_ref.shape
    ci = pl.program_id(0)
    nci = pl.num_programs(0)

    @pl.when(ci == 0)
    def _():
        h_s[...] = h0_ref[...]
        c_s[...] = c0_ref[...]

    # Fused hoisted input projection for the whole chunk: a single bf16 MXU
    # GEMM, f32 accumulate + bias, staged in VMEM.  Off the serial path.
    xp_s[...] = jnp.dot(x_ref[...], wih_ref[...],
                        preferred_element_type=jnp.float32) + b_ref[...]

    def make_step(masked):
        def step(t, carry):
            h = h_s[...]
            c = c_s[...]
            row = pl.multiple_of(t * Bp, Bp)
            gx = xp_s[pl.ds(row, Bp), :]
            # Only the small recurrent matmul sits on the serial chain.
            gates = gx + jnp.dot(h.astype(jnp.bfloat16), whh_ref[...],
                                 preferred_element_type=jnp.float32)
            # Gate blocks are lane-aligned (each slice is a 128-lane multiple).
            i_g = jax.nn.sigmoid(gates[:, 0 * Hp:1 * Hp])
            f_g = jax.nn.sigmoid(gates[:, 1 * Hp:2 * Hp])
            g_g = jnp.tanh(gates[:, 2 * Hp:3 * Hp])
            o_g = jax.nn.sigmoid(gates[:, 3 * Hp:4 * Hp])
            c_new = f_g * c + i_g * g_g
            h_new = o_g * jnp.tanh(c_new)
            if masked:
                valid = (ci * chunk + t) < seq_len
                c_new = jnp.where(valid, c_new, c)
                h_new = jnp.where(valid, h_new, h)
            c_s[...] = c_new
            h_s[...] = h_new
            out_ref[t] = h_new.astype(out_ref.dtype)
            return carry
        return step

    if (seq_len % chunk) != 0:
        # Trailing-time mask only on the last chunk; full chunks stay
        # select-free on the latency-bound serial path.
        @pl.when(ci < nci - 1)
        def _():
            jax.lax.fori_loop(0, chunk, make_step(False), 0, unroll=unroll)

        @pl.when(ci == nci - 1)
        def _():
            jax.lax.fori_loop(0, chunk, make_step(True), 0, unroll=unroll)
    else:
        jax.lax.fori_loop(0, chunk, make_step(False), 0, unroll=unroll)

    @pl.when(ci == nci - 1)
    def _():
        hn_ref[...] = h_s[...]
        cn_ref[...] = c_s[...]


def lstm_layer(x2d, wih_t, whh_t, bias, h0, c0, *, seq_len, chunk, Bp, Hp):
    """x2d: (Tp*Bp, Hp) bf16 time-major-flattened layer input."""
    Tp = x2d.shape[0] // Bp
    G4 = 4 * Hp
    nchunks = Tp // chunk

    kernel = functools.partial(_lstm_chunk_kernel, seq_len=seq_len,
                               unroll=min(chunk, 8))
    out_shapes = (
        jax.ShapeDtypeStruct((Tp, Bp, Hp), jnp.bfloat16),  # per-step hidden
        jax.ShapeDtypeStruct((Bp, Hp), jnp.float32),       # h_n
        jax.ShapeDtypeStruct((Bp, Hp), jnp.float32),       # c_n
    )
    grid_spec = pltpu.PrefetchScalarGridSpec(
        num_scalar_prefetch=0,
        grid=(nchunks,),
        in_specs=[
            pl.BlockSpec((chunk * Bp, Hp), lambda c: (c, 0)),
            pl.BlockSpec((Hp, G4), lambda c: (0, 0)),
            pl.BlockSpec((Hp, G4), lambda c: (0, 0)),
            pl.BlockSpec((1, G4), lambda c: (0, 0)),
            pl.BlockSpec((Bp, Hp), lambda c: (0, 0)),
            pl.BlockSpec((Bp, Hp), lambda c: (0, 0)),
        ],
        out_specs=[
            pl.BlockSpec((chunk, Bp, Hp), lambda c: (c, 0, 0)),
            pl.BlockSpec((Bp, Hp), lambda c: (0, 0)),
            pl.BlockSpec((Bp, Hp), lambda c: (0, 0)),
        ],
        scratch_shapes=[
            pltpu.VMEM((Bp, Hp), jnp.float32),          # h state
            pltpu.VMEM((Bp, Hp), jnp.float32),          # c state
            pltpu.VMEM((chunk * Bp, G4), jnp.float32),  # hoisted input proj
        ],
    )
    return pl.pallas_call(
        kernel,
        out_shape=out_shapes,
        grid_spec=grid_spec,
        compiler_params=pltpu.CompilerParams(
            dimension_semantics=("arbitrary",)),
    )(x2d, wih_t, whh_t, bias, h0, c0)


# ----------------------------------- module ----------------------------------

class BaseDecoderPallas:
    def __init__(self, hidden_size, vocab_size, output_size, n_layers,
                 dropout=0.2, share_weight=False, key=None):
        self.hidden_size = hidden_size
        self.vocab_size = vocab_size
        self.output_size = output_size
        self.n_layers = n_layers
        self.Hp = _round_up(hidden_size, 128)
        self.Op = _round_up(output_size, 128)

        if key is None:
            key = jax.random.PRNGKey(0)
        keys = jax.random.split(key, 3 + 4 * n_layers)
        scale = 1.0 / jnp.sqrt(jnp.float32(hidden_size))
        H, Hp, Op = hidden_size, self.Hp, self.Op

        # nn.Embedding(vocab, hidden, padding_idx=0): N(0,1), row 0 zeroed.
        emb = jax.random.normal(keys[0], (vocab_size, H), jnp.float32)
        emb = emb.at[0].set(0.0)

        # nn.Linear(hidden, output)
        proj_w = jax.random.uniform(keys[1], (output_size, H), jnp.float32,
                                    -scale, scale)
        proj_b = jax.random.uniform(keys[2], (output_size,), jnp.float32,
                                    -scale, scale)

        if share_weight:
            assert output_size == vocab_size, \
                "share_weight requires output_size == vocab_size"
            emb = proj_w   # PyTorch ties the Parameter; padding row not re-zeroed.

        # Pre-pad (lane-align) parameters once; MXU operands stored in bf16.
        self.emb_padded = (jnp.zeros((vocab_size, Hp), jnp.float32)
                           .at[:, :H].set(emb)).astype(jnp.bfloat16)
        self.proj_wt = (jnp.zeros((Hp, Op), jnp.float32)
                        .at[:H, :output_size].set(proj_w.T)).astype(jnp.bfloat16)
        self.proj_b = jnp.zeros((1, Op), jnp.float32).at[0, :output_size].set(proj_b)

        # nn.LSTM weights, uniform(-1/sqrt(H), 1/sqrt(H)), gate order i,f,g,o.
        # Stored transposed + gate-block padded: each gate occupies a
        # lane-aligned 128-multiple slice of the 4*Hp axis.
        def pad_gate_matrix(w, din):        # w: (4H, din) -> (Hp(din), 4Hp) bf16
            w4 = w.reshape(4, H, din)
            w4p = jnp.zeros((4, Hp, Hp), jnp.float32).at[:, :H, :din].set(w4)
            return w4p.reshape(4 * Hp, Hp).T.astype(jnp.bfloat16)

        def pad_gate_bias(b):               # (4H,) -> (1, 4Hp) f32
            b4 = b.reshape(4, H)
            b4p = jnp.zeros((4, Hp), jnp.float32).at[:, :H].set(b4)
            return b4p.reshape(1, 4 * Hp)

        self.lstm_padded = []
        for layer in range(n_layers):
            k0, k1, k2, k3 = keys[3 + 4 * layer: 3 + 4 * layer + 4]
            w_ih = jax.random.uniform(k0, (4 * H, H), jnp.float32, -scale, scale)
            w_hh = jax.random.uniform(k1, (4 * H, H), jnp.float32, -scale, scale)
            b_ih = jax.random.uniform(k2, (4 * H,), jnp.float32, -scale, scale)
            b_hh = jax.random.uniform(k3, (4 * H,), jnp.float32, -scale, scale)
            self.lstm_padded.append((
                pad_gate_matrix(w_ih, H),       # (Hp, 4Hp)  W_ih^T  bf16
                pad_gate_matrix(w_hh, H),       # (Hp, 4Hp)  W_hh^T  bf16
                pad_gate_bias(b_ih + b_hh),     # (1, 4Hp)           f32
            ))

    def __call__(self, inputs, length=None, hidden=None):
        # inputs: (B, T) int32 token ids.
        if length is not None:
            # TODO(synk): pack_padded_sequence path not implemented.
            raise NotImplementedError("length handling not implemented")

        B, T = inputs.shape
        H, Hp, L = self.hidden_size, self.Hp, self.n_layers
        Bp = _round_up(B, 8)                      # sublane-align batch
        chunk = min(T, 64)                        # time steps per grid step
        Tp = _round_up(T, chunk)

        # Time-major embedding gather: transpose the tiny int32 id matrix,
        # not the activations.
        tok = inputs.astype(jnp.int32)
        if Bp != B:
            tok = jnp.pad(tok, ((0, Bp - B), (0, 0)))
        tok_t = jnp.transpose(tok, (1, 0))              # (T, Bp)
        x = jnp.take(self.emb_padded, tok_t, axis=0)    # (T, Bp, Hp) bf16
        if Tp != T:
            x = jnp.pad(x, ((0, Tp - T), (0, 0), (0, 0)))
        x2d = x.reshape(Tp * Bp, Hp)                    # time-major slab

        if hidden is None:
            h0 = jnp.zeros((L, Bp, Hp), jnp.float32)
            c0 = jnp.zeros((L, Bp, Hp), jnp.float32)
        else:
            h0_u, c0_u = hidden                         # (L, B, H)
            h0 = jnp.zeros((L, Bp, Hp), jnp.float32).at[:, :B, :H].set(h0_u)
            c0 = jnp.zeros((L, Bp, Hp), jnp.float32).at[:, :B, :H].set(c0_u)

        h_ns, c_ns = [], []
        for layer in range(L):
            wih_t, whh_t, bias = self.lstm_padded[layer]
            out, h_n, c_n = lstm_layer(x2d, wih_t, whh_t, bias,
                                       h0[layer], c0[layer],
                                       seq_len=T, chunk=chunk, Bp=Bp, Hp=Hp)
            x2d = out.reshape(Tp * Bp, Hp)              # bf16, contiguous reshape
            h_ns.append(h_n[:B, :H])
            c_ns.append(c_n[:B, :H])
            # Dropout between layers is identity in inference mode.

        # Output projection on the time-major slab; transpose only the
        # (small) final logits tensor.
        logits = linear_pallas(x2d, self.proj_wt, self.proj_b)
        logits = logits.reshape(Tp, Bp, self.Op)[:T, :B, :self.output_size]
        logits = jnp.transpose(logits, (1, 0, 2))       # (B, T, O)
        return logits, (jnp.stack(h_ns, 0), jnp.stack(c_ns, 0))


# ------------------------------------ main -----------------------------------

if __name__ == "__main__":
    hidden_size = 32
    vocab_size = 40
    output_size = 48
    n_layers = 2
    B, T = 2, 8

    key = jax.random.PRNGKey(0)
    k_tok, k_param = jax.random.split(key)
    tokens = jax.random.randint(k_tok, (B, T), 0, vocab_size, dtype=jnp.int32)

    decoder = BaseDecoderPallas(hidden_size, vocab_size, output_size,
                                n_layers, key=k_param)

    logits, (h_n, c_n) = decoder(tokens)
    jax.block_until_ready((logits, h_n, c_n))

    assert logits.shape == (B, T, output_size)
    assert h_n.shape == (n_layers, B, hidden_size)
    assert c_n.shape == (n_layers, B, hidden_size)
    assert bool(jnp.all(jnp.isfinite(logits)))
    print("KERNEL_OK")
</pallas_src>

<mosaic_0001>
module attributes {stable_mosaic.version = 11 : i64} {
  func.func @_lstm_chunk_kernel(%arg0: i32, %arg1: memref<64x128xbf16, #tpu.memory_space<vmem>>, %arg2: memref<128x512xbf16, #tpu.memory_space<vmem>>, %arg3: memref<128x512xbf16, #tpu.memory_space<vmem>>, %arg4: memref<1x512xf32, #tpu.memory_space<vmem>>, %arg5: memref<8x128xf32, #tpu.memory_space<vmem>>, %arg6: memref<8x128xf32, #tpu.memory_space<vmem>>, %arg7: memref<8x8x128xbf16, #tpu.memory_space<vmem>>, %arg8: memref<8x128xf32, #tpu.memory_space<vmem>>, %arg9: memref<8x128xf32, #tpu.memory_space<vmem>>, %arg10: memref<8x128xf32, #tpu.memory_space<vmem>>, %arg11: memref<8x128xf32, #tpu.memory_space<vmem>>, %arg12: memref<64x512xf32, #tpu.memory_space<vmem>>) attributes {dimension_semantics = [#tpu.dimension_semantics<arbitrary>], iteration_bounds = array<i64: 1>, scalar_prefetch = 0 : i64, scratch_operands = 3 : i64, tpu.core_type = #tpu.core_type<tc>, window_params = [{transform_indices = @transform_0, window_bounds = array<i64: 64, 128>}, {pipeline_mode = #tpu.pipeline_mode<synchronous>, transform_indices = @transform_1, window_bounds = array<i64: 128, 512>}, {pipeline_mode = #tpu.pipeline_mode<synchronous>, transform_indices = @transform_2, window_bounds = array<i64: 128, 512>}, {pipeline_mode = #tpu.pipeline_mode<synchronous>, transform_indices = @transform_3, window_bounds = array<i64: 1, 512>}, {pipeline_mode = #tpu.pipeline_mode<synchronous>, transform_indices = @transform_4, window_bounds = array<i64: 8, 128>}, {pipeline_mode = #tpu.pipeline_mode<synchronous>, transform_indices = @transform_5, window_bounds = array<i64: 8, 128>}, {transform_indices = @transform_6, window_bounds = array<i64: 8, 8, 128>}, {pipeline_mode = #tpu.pipeline_mode<synchronous>, transform_indices = @transform_7, window_bounds = array<i64: 8, 128>}, {pipeline_mode = #tpu.pipeline_mode<synchronous>, transform_indices = @transform_8, window_bounds = array<i64: 8, 128>}]} {
    %c0_i32 = arith.constant 0 : i32
    %0 = arith.cmpi eq, %arg0, %c0_i32 : i32
    %1 = arith.extui %0 : i1 to i32
    %c0_i32_0 = arith.constant 0 : i32
    %2 = arith.cmpi ne, %1, %c0_i32_0 : i32
    scf.if %2 {
      %c0_155 = arith.constant 0 : index
      %c0_156 = arith.constant 0 : index
      %349 = vector.load %arg5[%c0_155, %c0_156] : memref<8x128xf32, #tpu.memory_space<vmem>>, vector<8x128xf32>
      %c0_157 = arith.constant 0 : index
      %c0_158 = arith.constant 0 : index
      %350 = vector.load %arg10[%c0_157, %c0_158] : memref<8x128xf32, #tpu.memory_space<vmem>>, vector<8x128xf32>
      tpu.vector_store %arg10[%c0_157, %c0_158], %349 {strides = array<i32>} : memref<8x128xf32, #tpu.memory_space<vmem>>, vector<8x128xf32>,
      %c0_159 = arith.constant 0 : index
      %c0_160 = arith.constant 0 : index
      %351 = vector.load %arg6[%c0_159, %c0_160] : memref<8x128xf32, #tpu.memory_space<vmem>>, vector<8x128xf32>
      %c0_161 = arith.constant 0 : index
      %c0_162 = arith.constant 0 : index
      %352 = vector.load %arg11[%c0_161, %c0_162] : memref<8x128xf32, #tpu.memory_space<vmem>>, vector<8x128xf32>
      tpu.vector_store %arg11[%c0_161, %c0_162], %351 {strides = array<i32>} : memref<8x128xf32, #tpu.memory_space<vmem>>, vector<8x128xf32>,
    } else {
    }
    %c0 = arith.constant 0 : index
    %c0_1 = arith.constant 0 : index
    %3 = vector.load %arg1[%c0, %c0_1] : memref<64x128xbf16, #tpu.memory_space<vmem>>, vector<64x128xbf16>
    %c0_2 = arith.constant 0 : index
    %c0_3 = arith.constant 0 : index
    %4 = vector.load %arg2[%c0_2, %c0_3] : memref<128x512xbf16, #tpu.memory_space<vmem>>, vector<128x512xbf16>
    %cst = arith.constant dense<0.000000e+00> : vector<64x512xf32>
    %5 = tpu.matmul %3, %4, %cst {dimension_numbers = #tpu.dot_dimension_numbers<[1], [0], [0], [1], [0, 0, 1, 1], [], []>} : vector<64x128xbf16>, vector<128x512xbf16>, vector<64x512xf32> -> vector<64x512xf32>
    %c0_4 = arith.constant 0 : index
    %c0_5 = arith.constant 0 : index
    %6 = vector.load %arg4[%c0_4, %c0_5] : memref<1x512xf32, #tpu.memory_space<vmem>>, vector<1x512xf32>
    %7 = vector.broadcast %6 : vector<1x512xf32> to vector<64x512xf32>
    %8 = arith.addf %5, %7 : vector<64x512xf32>
    %c0_6 = arith.constant 0 : index
    %c0_7 = arith.constant 0 : index
    %9 = vector.load %arg12[%c0_6, %c0_7] : memref<64x512xf32, #tpu.memory_space<vmem>>, vector<64x512xf32>
    tpu.vector_store %arg12[%c0_6, %c0_7], %8 {strides = array<i32>} : memref<64x512xf32, #tpu.memory_space<vmem>>, vector<64x512xf32>,
    %c0_i32_8 = arith.constant 0 : i32
    %c0_9 = arith.constant 0 : index
    %c0_10 = arith.constant 0 : index
    %10 = vector.load %arg10[%c0_9, %c0_10] : memref<8x128xf32, #tpu.memory_space<vmem>>, vector<8x128xf32>
    %c0_11 = arith.constant 0 : index
    %c0_12 = arith.constant 0 : index
    %11 = vector.load %arg11[%c0_11, %c0_12] : memref<8x128xf32, #tpu.memory_space<vmem>>, vector<8x128xf32>
    %c8_i32 = arith.constant 8 : i32
    %12 = arith.muli %c0_i32_8, %c8_i32 : i32
    %13 = tpu.assume_multiple %12, 8 : i32
    %14 = arith.index_cast %13 : i32 to index
    %c0_13 = arith.constant 0 : index
    %15 = vector.load %arg12[%14, %c0_13] : memref<64x512xf32, #tpu.memory_space<vmem>>, vector<8x512xf32>
    %16 = arith.truncf %10 : vector<8x128xf32> to vector<8x128xbf16>
    %c0_14 = arith.constant 0 : index
    %c0_15 = arith.constant 0 : index
    %17 = vector.load %arg3[%c0_14, %c0_15] : memref<128x512xbf16, #tpu.memory_space<vmem>>, vector<128x512xbf16>
    %cst_16 = arith.constant dense<0.000000e+00> : vector<8x512xf32>
    %18 = tpu.matmul %16, %17, %cst_16 {dimension_numbers = #tpu.dot_dimension_numbers<[1], [0], [0], [1], [0, 0, 1, 1], [], []>} : vector<8x128xbf16>, vector<128x512xbf16>, vector<8x512xf32> -> vector<8x512xf32>
    %19 = arith.addf %15, %18 : vector<8x512xf32>
    %20 = vector.extract_strided_slice %19 {offsets = [0, 0], sizes = [8, 128], strides = [1, 1]} : vector<8x512xf32> to vector<8x128xf32>
    %21 = arith.negf %20 : vector<8x128xf32>
    %22 = math.exp %21 : vector<8x128xf32>
    %cst_17 = arith.constant 1.000000e+00 : f32
    %23 = vector.broadcast %cst_17 : f32 to vector<8x128xf32>
    %24 = arith.addf %23, %22 : vector<8x128xf32>
    %25 = arith.divf %23, %24 : vector<8x128xf32>
    %26 = vector.extract_strided_slice %19 {offsets = [0, 128], sizes = [8, 128], strides = [1, 1]} : vector<8x512xf32> to vector<8x128xf32>
    %27 = arith.negf %26 : vector<8x128xf32>
    %28 = math.exp %27 : vector<8x128xf32>
    %cst_18 = arith.constant 1.000000e+00 : f32
    %29 = vector.broadcast %cst_18 : f32 to vector<8x128xf32>
    %30 = arith.addf %29, %28 : vector<8x128xf32>
    %31 = arith.divf %29, %30 : vector<8x128xf32>
    %32 = vector.extract_strided_slice %19 {offsets = [0, 256], sizes = [8, 128], strides = [1, 1]} : vector<8x512xf32> to vector<8x128xf32>
    %33 = math.tanh %32 : vector<8x128xf32>
    %34 = vector.extract_strided_slice %19 {offsets = [0, 384], sizes = [8, 128], strides = [1, 1]} : vector<8x512xf32> to vector<8x128xf32>
    %35 = arith.negf %34 : vector<8x128xf32>
    %36 = math.exp %35 : vector<8x128xf32>
    %cst_19 = arith.constant 1.000000e+00 : f32
    %37 = vector.broadcast %cst_19 : f32 to vector<8x128xf32>
    %38 = arith.addf %37, %36 : vector<8x128xf32>
    %39 = arith.divf %37, %38 : vector<8x128xf32>
    %40 = arith.mulf %31, %11 : vector<8x128xf32>
    %41 = arith.mulf %25, %33 : vector<8x128xf32>
    %42 = arith.addf %40, %41 : vector<8x128xf32>
    %43 = math.tanh %42 : vector<8x128xf32>
    %44 = arith.mulf %39, %43 : vector<8x128xf32>
    %c0_20 = arith.constant 0 : index
    %c0_21 = arith.constant 0 : index
    %45 = vector.load %arg11[%c0_20, %c0_21] : memref<8x128xf32, #tpu.memory_space<vmem>>, vector<8x128xf32>
    tpu.vector_store %arg11[%c0_20, %c0_21], %42 {strides = array<i32>} : memref<8x128xf32, #tpu.memory_space<vmem>>, vector<8x128xf32>,
    %c0_22 = arith.constant 0 : index
    %c0_23 = arith.constant 0 : index
    %46 = vector.load %arg10[%c0_22, %c0_23] : memref<8x128xf32, #tpu.memory_space<vmem>>, vector<8x128xf32>
    tpu.vector_store %arg10[%c0_22, %c0_23], %44 {strides = array<i32>} : memref<8x128xf32, #tpu.memory_space<vmem>>, vector<8x128xf32>,
    %47 = arith.truncf %44 : vector<8x128xf32> to vector<8x128xbf16>
    %48 = arith.index_cast %c0_i32_8 : i32 to index
    %c0_24 = arith.constant 0 : index
    %c0_25 = arith.constant 0 : index
    %49 = vector.load %arg7[%48, %c0_24, %c0_25] : memref<8x8x128xbf16, #tpu.memory_space<vmem>>, vector<1x8x128xbf16>
    %50 = vector.shape_cast %49 : vector<1x8x128xbf16> to vector<8x128xbf16>
    %51 = vector.shape_cast %47 : vector<8x128xbf16> to vector<1x8x128xbf16>
    tpu.vector_store %arg7[%48, %c0_24, %c0_25], %51 {strides = array<i32>} : memref<8x8x128xbf16, #tpu.memory_space<vmem>>, vector<1x8x128xbf16>,
    %c1_i32 = arith.constant 1 : i32
    %c0_26 = arith.constant 0 : index
    %c0_27 = arith.constant 0 : index
    %52 = vector.load %arg10[%c0_26, %c0_27] : memref<8x128xf32, #tpu.memory_space<vmem>>, vector<8x128xf32>
    %c0_28 = arith.constant 0 : index
    %c0_29 = arith.constant 0 : index
    %53 = vector.load %arg11[%c0_28, %c0_29] : memref<8x128xf32, #tpu.memory_space<vmem>>, vector<8x128xf32>
    %c8_i32_30 = arith.constant 8 : i32
    %54 = arith.muli %c1_i32, %c8_i32_30 : i32
    %55 = tpu.assume_multiple %54, 8 : i32
    %56 = arith.index_cast %55 : i32 to index
    %c0_31 = arith.constant 0 : index
    %57 = vector.load %arg12[%56, %c0_31] : memref<64x512xf32, #tpu.memory_space<vmem>>, vector<8x512xf32>
    %58 = arith.truncf %52 : vector<8x128xf32> to vector<8x128xbf16>
    %c0_32 = arith.constant 0 : index
    %c0_33 = arith.constant 0 : index
    %59 = vector.load %arg3[%c0_32, %c0_33] : memref<128x512xbf16, #tpu.memory_space<vmem>>, vector<128x512xbf16>
    %cst_34 = arith.constant dense<0.000000e+00> : vector<8x512xf32>
    %60 = tpu.matmul %58, %59, %cst_34 {dimension_numbers = #tpu.dot_dimension_numbers<[1], [0], [0], [1], [0, 0, 1, 1], [], []>} : vector<8x128xbf16>, vector<128x512xbf16>, vector<8x512xf32> -> vector<8x512xf32>
    %61 = arith.addf %57, %60 : vector<8x512xf32>
    %62 = vector.extract_strided_slice %61 {offsets = [0, 0], sizes = [8, 128], strides = [1, 1]} : vector<8x512xf32> to vector<8x128xf32>
    %63 = arith.negf %62 : vector<8x128xf32>
    %64 = math.exp %63 : vector<8x128xf32>
    %cst_35 = arith.constant 1.000000e+00 : f32
    %65 = vector.broadcast %cst_35 : f32 to vector<8x128xf32>
    %66 = arith.addf %65, %64 : vector<8x128xf32>
    %67 = arith.divf %65, %66 : vector<8x128xf32>
    %68 = vector.extract_strided_slice %61 {offsets = [0, 128], sizes = [8, 128], strides = [1, 1]} : vector<8x512xf32> to vector<8x128xf32>
    %69 = arith.negf %68 : vector<8x128xf32>
    %70 = math.exp %69 : vector<8x128xf32>
    %cst_36 = arith.constant 1.000000e+00 : f32
    %71 = vector.broadcast %cst_36 : f32 to vector<8x128xf32>
    %72 = arith.addf %71, %70 : vector<8x128xf32>
    %73 = arith.divf %71, %72 : vector<8x128xf32>
    %74 = vector.extract_strided_slice %61 {offsets = [0, 256], sizes = [8, 128], strides = [1, 1]} : vector<8x512xf32> to vector<8x128xf32>
    %75 = math.tanh %74 : vector<8x128xf32>
    %76 = vector.extract_strided_slice %61 {offsets = [0, 384], sizes = [8, 128], strides = [1, 1]} : vector<8x512xf32> to vector<8x128xf32>
    %77 = arith.negf %76 : vector<8x128xf32>
    %78 = math.exp %77 : vector<8x128xf32>
    %cst_37 = arith.constant 1.000000e+00 : f32
    %79 = vector.broadcast %cst_37 : f32 to vector<8x128xf32>
    %80 = arith.addf %79, %78 : vector<8x128xf32>
    %81 = arith.divf %79, %80 : vector<8x128xf32>
    %82 = arith.mulf %73, %53 : vector<8x128xf32>
    %83 = arith.mulf %67, %75 : vector<8x128xf32>
    %84 = arith.addf %82, %83 : vector<8x128xf32>
    %85 = math.tanh %84 : vector<8x128xf32>
    %86 = arith.mulf %81, %85 : vector<8x128xf32>
    %c0_38 = arith.constant 0 : index
    %c0_39 = arith.constant 0 : index
    %87 = vector.load %arg11[%c0_38, %c0_39] : memref<8x128xf32, #tpu.memory_space<vmem>>, vector<8x128xf32>
    tpu.vector_store %arg11[%c0_38, %c0_39], %84 {strides = array<i32>} : memref<8x128xf32, #tpu.memory_space<vmem>>, vector<8x128xf32>,
    %c0_40 = arith.constant 0 : index
    %c0_41 = arith.constant 0 : index
    %88 = vector.load %arg10[%c0_40, %c0_41] : memref<8x128xf32, #tpu.memory_space<vmem>>, vector<8x128xf32>
    tpu.vector_store %arg10[%c0_40, %c0_41], %86 {strides = array<i32>} : memref<8x128xf32, #tpu.memory_space<vmem>>, vector<8x128xf32>,
    %89 = arith.truncf %86 : vector<8x128xf32> to vector<8x128xbf16>
    %90 = arith.index_cast %c1_i32 : i32 to index
    %c0_42 = arith.constant 0 : index
    %c0_43 = arith.constant 0 : index
    %91 = vector.load %arg7[%90, %c0_42, %c0_43] : memref<8x8x128xbf16, #tpu.memory_space<vmem>>, vector<1x8x128xbf16>
    %92 = vector.shape_cast %91 : vector<1x8x128xbf16> to vector<8x128xbf16>
    %93 = vector.shape_cast %89 : vector<8x128xbf16> to vector<1x8x128xbf16>
    tpu.vector_store %arg7[%90, %c0_42, %c0_43], %93 {strides = array<i32>} : memref<8x8x128xbf16, #tpu.memory_space<vmem>>, vector<1x8x128xbf16>,
    %c2_i32 = arith.constant 2 : i32
    %c0_44 = arith.constant 0 : index
    %c0_45 = arith.constant 0 : index
    %94 = vector.load %arg10[%c0_44, %c0_45] : memref<8x128xf32, #tpu.memory_space<vmem>>, vector<8x128xf32>
    %c0_46 = arith.constant 0 : index
    %c0_47 = arith.constant 0 : index
    %95 = vector.load %arg11[%c0_46, %c0_47] : memref<8x128xf32, #tpu.memory_space<vmem>>, vector<8x128xf32>
    %c8_i32_48 = arith.constant 8 : i32
    %96 = arith.muli %c2_i32, %c8_i32_48 : i32
    %97 = tpu.assume_multiple %96, 8 : i32
    %98 = arith.index_cast %97 : i32 to index
    %c0_49 = arith.constant 0 : index
    %99 = vector.load %arg12[%98, %c0_49] : memref<64x512xf32, #tpu.memory_space<vmem>>, vector<8x512xf32>
    %100 = arith.truncf %94 : vector<8x128xf32> to vector<8x128xbf16>
    %c0_50 = arith.constant 0 : index
    %c0_51 = arith.constant 0 : index
    %101 = vector.load %arg3[%c0_50, %c0_51] : memref<128x512xbf16, #tpu.memory_space<vmem>>, vector<128x512xbf16>
    %cst_52 = arith.constant dense<0.000000e+00> : vector<8x512xf32>
    %102 = tpu.matmul %100, %101, %cst_52 {dimension_numbers = #tpu.dot_dimension_numbers<[1], [0], [0], [1], [0, 0, 1, 1], [], []>} : vector<8x128xbf16>, vector<128x512xbf16>, vector<8x512xf32> -> vector<8x512xf32>
    %103 = arith.addf %99, %102 : vector<8x512xf32>
    %104 = vector.extract_strided_slice %103 {offsets = [0, 0], sizes = [8, 128], strides = [1, 1]} : vector<8x512xf32> to vector<8x128xf32>
    %105 = arith.negf %104 : vector<8x128xf32>
    %106 = math.exp %105 : vector<8x128xf32>
    %cst_53 = arith.constant 1.000000e+00 : f32
    %107 = vector.broadcast %cst_53 : f32 to vector<8x128xf32>
    %108 = arith.addf %107, %106 : vector<8x128xf32>
    %109 = arith.divf %107, %108 : vector<8x128xf32>
    %110 = vector.extract_strided_slice %103 {offsets = [0, 128], sizes = [8, 128], strides = [1, 1]} : vector<8x512xf32> to vector<8x128xf32>
    %111 = arith.negf %110 : vector<8x128xf32>
    %112 = math.exp %111 : vector<8x128xf32>
    %cst_54 = arith.constant 1.000000e+00 : f32
    %113 = vector.broadcast %cst_54 : f32 to vector<8x128xf32>
    %114 = arith.addf %113, %112 : vector<8x128xf32>
    %115 = arith.divf %113, %114 : vector<8x128xf32>
    %116 = vector.extract_strided_slice %103 {offsets = [0, 256], sizes = [8, 128], strides = [1, 1]} : vector<8x512xf32> to vector<8x128xf32>
    %117 = math.tanh %116 : vector<8x128xf32>
    %118 = vector.extract_strided_slice %103 {offsets = [0, 384], sizes = [8, 128], strides = [1, 1]} : vector<8x512xf32> to vector<8x128xf32>
    %119 = arith.negf %118 : vector<8x128xf32>
    %120 = math.exp %119 : vector<8x128xf32>
    %cst_55 = arith.constant 1.000000e+00 : f32
    %121 = vector.broadcast %cst_55 : f32 to vector<8x128xf32>
    %122 = arith.addf %121, %120 : vector<8x128xf32>
    %123 = arith.divf %121, %122 : vector<8x128xf32>
    %124 = arith.mulf %115, %95 : vector<8x128xf32>
    %125 = arith.mulf %109, %117 : vector<8x128xf32>
    %126 = arith.addf %124, %125 : vector<8x128xf32>
    %127 = math.tanh %126 : vector<8x128xf32>
    %128 = arith.mulf %123, %127 : vector<8x128xf32>
    %c0_56 = arith.constant 0 : index
    %c0_57 = arith.constant 0 : index
    %129 = vector.load %arg11[%c0_56, %c0_57] : memref<8x128xf32, #tpu.memory_space<vmem>>, vector<8x128xf32>
    tpu.vector_store %arg11[%c0_56, %c0_57], %126 {strides = array<i32>} : memref<8x128xf32, #tpu.memory_space<vmem>>, vector<8x128xf32>,
    %c0_58 = arith.constant 0 : index
    %c0_59 = arith.constant 0 : index
    %130 = vector.load %arg10[%c0_58, %c0_59] : memref<8x128xf32, #tpu.memory_space<vmem>>, vector<8x128xf32>
    tpu.vector_store %arg10[%c0_58, %c0_59], %128 {strides = array<i32>} : memref<8x128xf32, #tpu.memory_space<vmem>>, vector<8x128xf32>,
    %131 = arith.truncf %128 : vector<8x128xf32> to vector<8x128xbf16>
    %132 = arith.index_cast %c2_i32 : i32 to index
    %c0_60 = arith.constant 0 : index
    %c0_61 = arith.constant 0 : index
    %133 = vector.load %arg7[%132, %c0_60, %c0_61] : memref<8x8x128xbf16, #tpu.memory_space<vmem>>, vector<1x8x128xbf16>
    %134 = vector.shape_cast %133 : vector<1x8x128xbf16> to vector<8x128xbf16>
    %135 = vector.shape_cast %131 : vector<8x128xbf16> to vector<1x8x128xbf16>
    tpu.vector_store %arg7[%132, %c0_60, %c0_61], %135 {strides = array<i32>} : memref<8x8x128xbf16, #tpu.memory_space<vmem>>, vector<1x8x128xbf16>,
    %c3_i32 = arith.constant 3 : i32
    %c0_62 = arith.constant 0 : index
    %c0_63 = arith.constant 0 : index
    %136 = vector.load %arg10[%c0_62, %c0_63] : memref<8x128xf32, #tpu.memory_space<vmem>>, vector<8x128xf32>
    %c0_64 = arith.constant 0 : index
    %c0_65 = arith.constant 0 : index
    %137 = vector.load %arg11[%c0_64, %c0_65] : memref<8x128xf32, #tpu.memory_space<vmem>>, vector<8x128xf32>
    %c8_i32_66 = arith.constant 8 : i32
    %138 = arith.muli %c3_i32, %c8_i32_66 : i32
    %139 = tpu.assume_multiple %138, 8 : i32
    %140 = arith.index_cast %139 : i32 to index
    %c0_67 = arith.constant 0 : index
    %141 = vector.load %arg12[%140, %c0_67] : memref<64x512xf32, #tpu.memory_space<vmem>>, vector<8x512xf32>
    %142 = arith.truncf %136 : vector<8x128xf32> to vector<8x128xbf16>
    %c0_68 = arith.constant 0 : index
    %c0_69 = arith.constant 0 : index
    %143 = vector.load %arg3[%c0_68, %c0_69] : memref<128x512xbf16, #tpu.memory_space<vmem>>, vector<128x512xbf16>
    %cst_70 = arith.constant dense<0.000000e+00> : vector<8x512xf32>
    %144 = tpu.matmul %142, %143, %cst_70 {dimension_numbers = #tpu.dot_dimension_numbers<[1], [0], [0], [1], [0, 0, 1, 1], [], []>} : vector<8x128xbf16>, vector<128x512xbf16>, vector<8x512xf32> -> vector<8x512xf32>
    %145 = arith.addf %141, %144 : vector<8x512xf32>
    %146 = vector.extract_strided_slice %145 {offsets = [0, 0], sizes = [8, 128], strides = [1, 1]} : vector<8x512xf32> to vector<8x128xf32>
    %147 = arith.negf %146 : vector<8x128xf32>
    %148 = math.exp %147 : vector<8x128xf32>
    %cst_71 = arith.constant 1.000000e+00 : f32
    %149 = vector.broadcast %cst_71 : f32 to vector<8x128xf32>
    %150 = arith.addf %149, %148 : vector<8x128xf32>
    %151 = arith.divf %149, %150 : vector<8x128xf32>
    %152 = vector.extract_strided_slice %145 {offsets = [0, 128], sizes = [8, 128], strides = [1, 1]} : vector<8x512xf32> to vector<8x128xf32>
    %153 = arith.negf %152 : vector<8x128xf32>
    %154 = math.exp %153 : vector<8x128xf32>
    %cst_72 = arith.constant 1.000000e+00 : f32
    %155 = vector.broadcast %cst_72 : f32 to vector<8x128xf32>
    %156 = arith.addf %155, %154 : vector<8x128xf32>
    %157 = arith.divf %155, %156 : vector<8x128xf32>
    %158 = vector.extract_strided_slice %145 {offsets = [0, 256], sizes = [8, 128], strides = [1, 1]} : vector<8x512xf32> to vector<8x128xf32>
    %159 = math.tanh %158 : vector<8x128xf32>
    %160 = vector.extract_strided_slice %145 {offsets = [0, 384], sizes = [8, 128], strides = [1, 1]} : vector<8x512xf32> to vector<8x128xf32>
    %161 = arith.negf %160 : vector<8x128xf32>
    %162 = math.exp %161 : vector<8x128xf32>
    %cst_73 = arith.constant 1.000000e+00 : f32
    %163 = vector.broadcast %cst_73 : f32 to vector<8x128xf32>
    %164 = arith.addf %163, %162 : vector<8x128xf32>
    %165 = arith.divf %163, %164 : vector<8x128xf32>
    %166 = arith.mulf %157, %137 : vector<8x128xf32>
    %167 = arith.mulf %151, %159 : vector<8x128xf32>
    %168 = arith.addf %166, %167 : vector<8x128xf32>
    %169 = math.tanh %168 : vector<8x128xf32>
    %170 = arith.mulf %165, %169 : vector<8x128xf32>
    %c0_74 = arith.constant 0 : index
    %c0_75 = arith.constant 0 : index
    %171 = vector.load %arg11[%c0_74, %c0_75] : memref<8x128xf32, #tpu.memory_space<vmem>>, vector<8x128xf32>
    tpu.vector_store %arg11[%c0_74, %c0_75], %168 {strides = array<i32>} : memref<8x128xf32, #tpu.memory_space<vmem>>, vector<8x128xf32>,
    %c0_76 = arith.constant 0 : index
    %c0_77 = arith.constant 0 : index
    %172 = vector.load %arg10[%c0_76, %c0_77] : memref<8x128xf32, #tpu.memory_space<vmem>>, vector<8x128xf32>
    tpu.vector_store %arg10[%c0_76, %c0_77], %170 {strides = array<i32>} : memref<8x128xf32, #tpu.memory_space<vmem>>, vector<8x128xf32>,
    %173 = arith.truncf %170 : vector<8x128xf32> to vector<8x128xbf16>
    %174 = arith.index_cast %c3_i32 : i32 to index
    %c0_78 = arith.constant 0 : index
    %c0_79 = arith.constant 0 : index
    %175 = vector.load %arg7[%174, %c0_78, %c0_79] : memref<8x8x128xbf16, #tpu.memory_space<vmem>>, vector<1x8x128xbf16>
    %176 = vector.shape_cast %175 : vector<1x8x128xbf16> to vector<8x128xbf16>
    %177 = vector.shape_cast %173 : vector<8x128xbf16> to vector<1x8x128xbf16>
    tpu.vector_store %arg7[%174, %c0_78, %c0_79], %177 {strides = array<i32>} : memref<8x8x128xbf16, #tpu.memory_space<vmem>>, vector<1x8x128xbf16>,
    %c4_i32 = arith.constant 4 : i32
    %c0_80 = arith.constant 0 : index
    %c0_81 = arith.constant 0 : index
    %178 = vector.load %arg10[%c0_80, %c0_81] : memref<8x128xf32, #tpu.memory_space<vmem>>, vector<8x128xf32>
    %c0_82 = arith.constant 0 : index
    %c0_83 = arith.constant 0 : index
    %179 = vector.load %arg11[%c0_82, %c0_83] : memref<8x128xf32, #tpu.memory_space<vmem>>, vector<8x128xf32>
    %c8_i32_84 = arith.constant 8 : i32
    %180 = arith.muli %c4_i32, %c8_i32_84 : i32
    %181 = tpu.assume_multiple %180, 8 : i32
    %182 = arith.index_cast %181 : i32 to index
    %c0_85 = arith.constant 0 : index
    %183 = vector.load %arg12[%182, %c0_85] : memref<64x512xf32, #tpu.memory_space<vmem>>, vector<8x512xf32>
    %184 = arith.truncf %178 : vector<8x128xf32> to vector<8x128xbf16>
    %c0_86 = arith.constant 0 : index
    %c0_87 = arith.constant 0 : index
    %185 = vector.load %arg3[%c0_86, %c0_87] : memref<128x512xbf16, #tpu.memory_space<vmem>>, vector<128x512xbf16>
    %cst_88 = arith.constant dense<0.000000e+00> : vector<8x512xf32>
    %186 = tpu.matmul %184, %185, %cst_88 {dimension_numbers = #tpu.dot_dimension_numbers<[1], [0], [0], [1], [0, 0, 1, 1], [], []>} : vector<8x128xbf16>, vector<128x512xbf16>, vector<8x512xf32> -> vector<8x512xf32>
    %187 = arith.addf %183, %186 : vector<8x512xf32>
    %188 = vector.extract_strided_slice %187 {offsets = [0, 0], sizes = [8, 128], strides = [1, 1]} : vector<8x512xf32> to vector<8x128xf32>
    %189 = arith.negf %188 : vector<8x128xf32>
    %190 = math.exp %189 : vector<8x128xf32>
    %cst_89 = arith.constant 1.000000e+00 : f32
    %191 = vector.broadcast %cst_89 : f32 to vector<8x128xf32>
    %192 = arith.addf %191, %190 : vector<8x128xf32>
    %193 = arith.divf %191, %192 : vector<8x128xf32>
    %194 = vector.extract_strided_slice %187 {offsets = [0, 128], sizes = [8, 128], strides = [1, 1]} : vector<8x512xf32> to vector<8x128xf32>
    %195 = arith.negf %194 : vector<8x128xf32>
    %196 = math.exp %195 : vector<8x128xf32>
    %cst_90 = arith.constant 1.000000e+00 : f32
    %197 = vector.broadcast %cst_90 : f32 to vector<8x128xf32>
    %198 = arith.addf %197, %196 : vector<8x128xf32>
    %199 = arith.divf %197, %198 : vector<8x128xf32>
    %200 = vector.extract_strided_slice %187 {offsets = [0, 256], sizes = [8, 128], strides = [1, 1]} : vector<8x512xf32> to vector<8x128xf32>
    %201 = math.tanh %200 : vector<8x128xf32>
    %202 = vector.extract_strided_slice %187 {offsets = [0, 384], sizes = [8, 128], strides = [1, 1]} : vector<8x512xf32> to vector<8x128xf32>
    %203 = arith.negf %202 : vector<8x128xf32>
    %204 = math.exp %203 : vector<8x128xf32>
    %cst_91 = arith.constant 1.000000e+00 : f32
    %205 = vector.broadcast %cst_91 : f32 to vector<8x128xf32>
    %206 = arith.addf %205, %204 : vector<8x128xf32>
    %207 = arith.divf %205, %206 : vector<8x128xf32>
    %208 = arith.mulf %199, %179 : vector<8x128xf32>
    %209 = arith.mulf %193, %201 : vector<8x128xf32>
    %210 = arith.addf %208, %209 : vector<8x128xf32>
    %211 = math.tanh %210 : vector<8x128xf32>
    %212 = arith.mulf %207, %211 : vector<8x128xf32>
    %c0_92 = arith.constant 0 : index
    %c0_93 = arith.constant 0 : index
    %213 = vector.load %arg11[%c0_92, %c0_93] : memref<8x128xf32, #tpu.memory_space<vmem>>, vector<8x128xf32>
    tpu.vector_store %arg11[%c0_92, %c0_93], %210 {strides = array<i32>} : memref<8x128xf32, #tpu.memory_space<vmem>>, vector<8x128xf32>,
    %c0_94 = arith.constant 0 : index
    %c0_95 = arith.constant 0 : index
    %214 = vector.load %arg10[%c0_94, %c0_95] : memref<8x128xf32, #tpu.memory_space<vmem>>, vector<8x128xf32>
    tpu.vector_store %arg10[%c0_94, %c0_95], %212 {strides = array<i32>} : memref<8x128xf32, #tpu.memory_space<vmem>>, vector<8x128xf32>,
    %215 = arith.truncf %212 : vector<8x128xf32> to vector<8x128xbf16>
    %216 = arith.index_cast %c4_i32 : i32 to index
    %c0_96 = arith.constant 0 : index
    %c0_97 = arith.constant 0 : index
    %217 = vector.load %arg7[%216, %c0_96, %c0_97] : memref<8x8x128xbf16, #tpu.memory_space<vmem>>, vector<1x8x128xbf16>
    %218 = vector.shape_cast %217 : vector<1x8x128xbf16> to vector<8x128xbf16>
    %219 = vector.shape_cast %215 : vector<8x128xbf16> to vector<1x8x128xbf16>
    tpu.vector_store %arg7[%216, %c0_96, %c0_97], %219 {strides = array<i32>} : memref<8x8x128xbf16, #tpu.memory_space<vmem>>, vector<1x8x128xbf16>,
    %c5_i32 = arith.constant 5 : i32
    %c0_98 = arith.constant 0 : index
    %c0_99 = arith.constant 0 : index
    %220 = vector.load %arg10[%c0_98, %c0_99] : memref<8x128xf32, #tpu.memory_space<vmem>>, vector<8x128xf32>
    %c0_100 = arith.constant 0 : index
    %c0_101 = arith.constant 0 : index
    %221 = vector.load %arg11[%c0_100, %c0_101] : memref<8x128xf32, #tpu.memory_space<vmem>>, vector<8x128xf32>
    %c8_i32_102 = arith.constant 8 : i32
    %222 = arith.muli %c5_i32, %c8_i32_102 : i32
    %223 = tpu.assume_multiple %222, 8 : i32
    %224 = arith.index_cast %223 : i32 to index
    %c0_103 = arith.constant 0 : index
    %225 = vector.load %arg12[%224, %c0_103] : memref<64x512xf32, #tpu.memory_space<vmem>>, vector<8x512xf32>
    %226 = arith.truncf %220 : vector<8x128xf32> to vector<8x128xbf16>
    %c0_104 = arith.constant 0 : index
    %c0_105 = arith.constant 0 : index
    %227 = vector.load %arg3[%c0_104, %c0_105] : memref<128x512xbf16, #tpu.memory_space<vmem>>, vector<128x512xbf16>
    %cst_106 = arith.constant dense<0.000000e+00> : vector<8x512xf32>
    %228 = tpu.matmul %226, %227, %cst_106 {dimension_numbers = #tpu.dot_dimension_numbers<[1], [0], [0], [1], [0, 0, 1, 1], [], []>} : vector<8x128xbf16>, vector<128x512xbf16>, vector<8x512xf32> -> vector<8x512xf32>
    %229 = arith.addf %225, %228 : vector<8x512xf32>
    %230 = vector.extract_strided_slice %229 {offsets = [0, 0], sizes = [8, 128], strides = [1, 1]} : vector<8x512xf32> to vector<8x128xf32>
    %231 = arith.negf %230 : vector<8x128xf32>
    %232 = math.exp %231 : vector<8x128xf32>
    %cst_107 = arith.constant 1.000000e+00 : f32
    %233 = vector.broadcast %cst_107 : f32 to vector<8x128xf32>
    %234 = arith.addf %233, %232 : vector<8x128xf32>
    %235 = arith.divf %233, %234 : vector<8x128xf32>
    %236 = vector.extract_strided_slice %229 {offsets = [0, 128], sizes = [8, 128], strides = [1, 1]} : vector<8x512xf32> to vector<8x128xf32>
    %237 = arith.negf %236 : vector<8x128xf32>
    %238 = math.exp %237 : vector<8x128xf32>
    %cst_108 = arith.constant 1.000000e+00 : f32
    %239 = vector.broadcast %cst_108 : f32 to vector<8x128xf32>
    %240 = arith.addf %239, %238 : vector<8x128xf32>
    %241 = arith.divf %239, %240 : vector<8x128xf32>
    %242 = vector.extract_strided_slice %229 {offsets = [0, 256], sizes = [8, 128], strides = [1, 1]} : vector<8x512xf32> to vector<8x128xf32>
    %243 = math.tanh %242 : vector<8x128xf32>
    %244 = vector.extract_strided_slice %229 {offsets = [0, 384], sizes = [8, 128], strides = [1, 1]} : vector<8x512xf32> to vector<8x128xf32>
    %245 = arith.negf %244 : vector<8x128xf32>
    %246 = math.exp %245 : vector<8x128xf32>
    %cst_109 = arith.constant 1.000000e+00 : f32
    %247 = vector.broadcast %cst_109 : f32 to vector<8x128xf32>
    %248 = arith.addf %247, %246 : vector<8x128xf32>
    %249 = arith.divf %247, %248 : vector<8x128xf32>
    %250 = arith.mulf %241, %221 : vector<8x128xf32>
    %251 = arith.mulf %235, %243 : vector<8x128xf32>
    %252 = arith.addf %250, %251 : vector<8x128xf32>
    %253 = math.tanh %252 : vector<8x128xf32>
    %254 = arith.mulf %249, %253 : vector<8x128xf32>
    %c0_110 = arith.constant 0 : index
    %c0_111 = arith.constant 0 : index
    %255 = vector.load %arg11[%c0_110, %c0_111] : memref<8x128xf32, #tpu.memory_space<vmem>>, vector<8x128xf32>
    tpu.vector_store %arg11[%c0_110, %c0_111], %252 {strides = array<i32>} : memref<8x128xf32, #tpu.memory_space<vmem>>, vector<8x128xf32>,
    %c0_112 = arith.constant 0 : index
    %c0_113 = arith.constant 0 : index
    %256 = vector.load %arg10[%c0_112, %c0_113] : memref<8x128xf32, #tpu.memory_space<vmem>>, vector<8x128xf32>
    tpu.vector_store %arg10[%c0_112, %c0_113], %254 {strides = array<i32>} : memref<8x128xf32, #tpu.memory_space<vmem>>, vector<8x128xf32>,
    %257 = arith.truncf %254 : vector<8x128xf32> to vector<8x128xbf16>
    %258 = arith.index_cast %c5_i32 : i32 to index
    %c0_114 = arith.constant 0 : index
    %c0_115 = arith.constant 0 : index
    %259 = vector.load %arg7[%258, %c0_114, %c0_115] : memref<8x8x128xbf16, #tpu.memory_space<vmem>>, vector<1x8x128xbf16>
    %260 = vector.shape_cast %259 : vector<1x8x128xbf16> to vector<8x128xbf16>
    %261 = vector.shape_cast %257 : vector<8x128xbf16> to vector<1x8x128xbf16>
    tpu.vector_store %arg7[%258, %c0_114, %c0_115], %261 {strides = array<i32>} : memref<8x8x128xbf16, #tpu.memory_space<vmem>>, vector<1x8x128xbf16>,
    %c6_i32 = arith.constant 6 : i32
    %c0_116 = arith.constant 0 : index
    %c0_117 = arith.constant 0 : index
    %262 = vector.load %arg10[%c0_116, %c0_117] : memref<8x128xf32, #tpu.memory_space<vmem>>, vector<8x128xf32>
    %c0_118 = arith.constant 0 : index
    %c0_119 = arith.constant 0 : index
    %263 = vector.load %arg11[%c0_118, %c0_119] : memref<8x128xf32, #tpu.memory_space<vmem>>, vector<8x128xf32>
    %c8_i32_120 = arith.constant 8 : i32
    %264 = arith.muli %c6_i32, %c8_i32_120 : i32
    %265 = tpu.assume_multiple %264, 8 : i32
    %266 = arith.index_cast %265 : i32 to index
    %c0_121 = arith.constant 0 : index
    %267 = vector.load %arg12[%266, %c0_121] : memref<64x512xf32, #tpu.memory_space<vmem>>, vector<8x512xf32>
    %268 = arith.truncf %262 : vector<8x128xf32> to vector<8x128xbf16>
    %c0_122 = arith.constant 0 : index
    %c0_123 = arith.constant 0 : index
    %269 = vector.load %arg3[%c0_122, %c0_123] : memref<128x512xbf16, #tpu.memory_space<vmem>>, vector<128x512xbf16>
    %cst_124 = arith.constant dense<0.000000e+00> : vector<8x512xf32>
    %270 = tpu.matmul %268, %269, %cst_124 {dimension_numbers = #tpu.dot_dimension_numbers<[1], [0], [0], [1], [0, 0, 1, 1], [], []>} : vector<8x128xbf16>, vector<128x512xbf16>, vector<8x512xf32> -> vector<8x512xf32>
    %271 = arith.addf %267, %270 : vector<8x512xf32>
    %272 = vector.extract_strided_slice %271 {offsets = [0, 0], sizes = [8, 128], strides = [1, 1]} : vector<8x512xf32> to vector<8x128xf32>
    %273 = arith.negf %272 : vector<8x128xf32>
    %274 = math.exp %273 : vector<8x128xf32>
    %cst_125 = arith.constant 1.000000e+00 : f32
    %275 = vector.broadcast %cst_125 : f32 to vector<8x128xf32>
    %276 = arith.addf %275, %274 : vector<8x128xf32>
    %277 = arith.divf %275, %276 : vector<8x128xf32>
    %278 = vector.extract_strided_slice %271 {offsets = [0, 128], sizes = [8, 128], strides = [1, 1]} : vector<8x512xf32> to vector<8x128xf32>
    %279 = arith.negf %278 : vector<8x128xf32>
    %280 = math.exp %279 : vector<8x128xf32>
    %cst_126 = arith.constant 1.000000e+00 : f32
    %281 = vector.broadcast %cst_126 : f32 to vector<8x128xf32>
    %282 = arith.addf %281, %280 : vector<8x128xf32>
    %283 = arith.divf %281, %282 : vector<8x128xf32>
    %284 = vector.extract_strided_slice %271 {offsets = [0, 256], sizes = [8, 128], strides = [1, 1]} : vector<8x512xf32> to vector<8x128xf32>
    %285 = math.tanh %284 : vector<8x128xf32>
    %286 = vector.extract_strided_slice %271 {offsets = [0, 384], sizes = [8, 128], strides = [1, 1]} : vector<8x512xf32> to vector<8x128xf32>
    %287 = arith.negf %286 : vector<8x128xf32>
    %288 = math.exp %287 : vector<8x128xf32>
    %cst_127 = arith.constant 1.000000e+00 : f32
    %289 = vector.broadcast %cst_127 : f32 to vector<8x128xf32>
    %290 = arith.addf %289, %288 : vector<8x128xf32>
    %291 = arith.divf %289, %290 : vector<8x128xf32>
    %292 = arith.mulf %283, %263 : vector<8x128xf32>
    %293 = arith.mulf %277, %285 : vector<8x128xf32>
    %294 = arith.addf %292, %293 : vector<8x128xf32>
    %295 = math.tanh %294 : vector<8x128xf32>
    %296 = arith.mulf %291, %295 : vector<8x128xf32>
    %c0_128 = arith.constant 0 : index
    %c0_129 = arith.constant 0 : index
    %297 = vector.load %arg11[%c0_128, %c0_129] : memref<8x128xf32, #tpu.memory_space<vmem>>, vector<8x128xf32>
    tpu.vector_store %arg11[%c0_128, %c0_129], %294 {strides = array<i32>} : memref<8x128xf32, #tpu.memory_space<vmem>>, vector<8x128xf32>,
    %c0_130 = arith.constant 0 : index
    %c0_131 = arith.constant 0 : index
    %298 = vector.load %arg10[%c0_130, %c0_131] : memref<8x128xf32, #tpu.memory_space<vmem>>, vector<8x128xf32>
    tpu.vector_store %arg10[%c0_130, %c0_131], %296 {strides = array<i32>} : memref<8x128xf32, #tpu.memory_space<vmem>>, vector<8x128xf32>,
    %299 = arith.truncf %296 : vector<8x128xf32> to vector<8x128xbf16>
    %300 = arith.index_cast %c6_i32 : i32 to index
    %c0_132 = arith.constant 0 : index
    %c0_133 = arith.constant 0 : index
    %301 = vector.load %arg7[%300, %c0_132, %c0_133] : memref<8x8x128xbf16, #tpu.memory_space<vmem>>, vector<1x8x128xbf16>
    %302 = vector.shape_cast %301 : vector<1x8x128xbf16> to vector<8x128xbf16>
    %303 = vector.shape_cast %299 : vector<8x128xbf16> to vector<1x8x128xbf16>
    tpu.vector_store %arg7[%300, %c0_132, %c0_133], %303 {strides = array<i32>} : memref<8x8x128xbf16, #tpu.memory_space<vmem>>, vector<1x8x128xbf16>,
    %c7_i32 = arith.constant 7 : i32
    %c0_134 = arith.constant 0 : index
    %c0_135 = arith.constant 0 : index
    %304 = vector.load %arg10[%c0_134, %c0_135] : memref<8x128xf32, #tpu.memory_space<vmem>>, vector<8x128xf32>
    %c0_136 = arith.constant 0 : index
    %c0_137 = arith.constant 0 : index
    %305 = vector.load %arg11[%c0_136, %c0_137] : memref<8x128xf32, #tpu.memory_space<vmem>>, vector<8x128xf32>
    %c8_i32_138 = arith.constant 8 : i32
    %306 = arith.muli %c7_i32, %c8_i32_138 : i32
    %307 = tpu.assume_multiple %306, 8 : i32
    %308 = arith.index_cast %307 : i32 to index
    %c0_139 = arith.constant 0 : index
    %309 = vector.load %arg12[%308, %c0_139] : memref<64x512xf32, #tpu.memory_space<vmem>>, vector<8x512xf32>
    %310 = arith.truncf %304 : vector<8x128xf32> to vector<8x128xbf16>
    %c0_140 = arith.constant 0 : index
    %c0_141 = arith.constant 0 : index
    %311 = vector.load %arg3[%c0_140, %c0_141] : memref<128x512xbf16, #tpu.memory_space<vmem>>, vector<128x512xbf16>
    %cst_142 = arith.constant dense<0.000000e+00> : vector<8x512xf32>
    %312 = tpu.matmul %310, %311, %cst_142 {dimension_numbers = #tpu.dot_dimension_numbers<[1], [0], [0], [1], [0, 0, 1, 1], [], []>} : vector<8x128xbf16>, vector<128x512xbf16>, vector<8x512xf32> -> vector<8x512xf32>
    %313 = arith.addf %309, %312 : vector<8x512xf32>
    %314 = vector.extract_strided_slice %313 {offsets = [0, 0], sizes = [8, 128], strides = [1, 1]} : vector<8x512xf32> to vector<8x128xf32>
    %315 = arith.negf %314 : vector<8x128xf32>
    %316 = math.exp %315 : vector<8x128xf32>
    %cst_143 = arith.constant 1.000000e+00 : f32
    %317 = vector.broadcast %cst_143 : f32 to vector<8x128xf32>
    %318 = arith.addf %317, %316 : vector<8x128xf32>
    %319 = arith.divf %317, %318 : vector<8x128xf32>
    %320 = vector.extract_strided_slice %313 {offsets = [0, 128], sizes = [8, 128], strides = [1, 1]} : vector<8x512xf32> to vector<8x128xf32>
    %321 = arith.negf %320 : vector<8x128xf32>
    %322 = math.exp %321 : vector<8x128xf32>
    %cst_144 = arith.constant 1.000000e+00 : f32
    %323 = vector.broadcast %cst_144 : f32 to vector<8x128xf32>
    %324 = arith.addf %323, %322 : vector<8x128xf32>
    %325 = arith.divf %323, %324 : vector<8x128xf32>
    %326 = vector.extract_strided_slice %313 {offsets = [0, 256], sizes = [8, 128], strides = [1, 1]} : vector<8x512xf32> to vector<8x128xf32>
    %327 = math.tanh %326 : vector<8x128xf32>
    %328 = vector.extract_strided_slice %313 {offsets = [0, 384], sizes = [8, 128], strides = [1, 1]} : vector<8x512xf32> to vector<8x128xf32>
    %329 = arith.negf %328 : vector<8x128xf32>
    %330 = math.exp %329 : vector<8x128xf32>
    %cst_145 = arith.constant 1.000000e+00 : f32
    %331 = vector.broadcast %cst_145 : f32 to vector<8x128xf32>
    %332 = arith.addf %331, %330 : vector<8x128xf32>
    %333 = arith.divf %331, %332 : vector<8x128xf32>
    %334 = arith.mulf %325, %305 : vector<8x128xf32>
    %335 = arith.mulf %319, %327 : vector<8x128xf32>
    %336 = arith.addf %334, %335 : vector<8x128xf32>
    %337 = math.tanh %336 : vector<8x128xf32>
    %338 = arith.mulf %333, %337 : vector<8x128xf32>
    %c0_146 = arith.constant 0 : index
    %c0_147 = arith.constant 0 : index
    %339 = vector.load %arg11[%c0_146, %c0_147] : memref<8x128xf32, #tpu.memory_space<vmem>>, vector<8x128xf32>
    tpu.vector_store %arg11[%c0_146, %c0_147], %336 {strides = array<i32>} : memref<8x128xf32, #tpu.memory_space<vmem>>, vector<8x128xf32>,
    %c0_148 = arith.constant 0 : index
    %c0_149 = arith.constant 0 : index
    %340 = vector.load %arg10[%c0_148, %c0_149] : memref<8x128xf32, #tpu.memory_space<vmem>>, vector<8x128xf32>
    tpu.vector_store %arg10[%c0_148, %c0_149], %338 {strides = array<i32>} : memref<8x128xf32, #tpu.memory_space<vmem>>, vector<8x128xf32>,
    %341 = arith.truncf %338 : vector<8x128xf32> to vector<8x128xbf16>
    %342 = arith.index_cast %c7_i32 : i32 to index
    %c0_150 = arith.constant 0 : index
    %c0_151 = arith.constant 0 : index
    %343 = vector.load %arg7[%342, %c0_150, %c0_151] : memref<8x8x128xbf16, #tpu.memory_space<vmem>>, vector<1x8x128xbf16>
    %344 = vector.shape_cast %343 : vector<1x8x128xbf16> to vector<8x128xbf16>
    %345 = vector.shape_cast %341 : vector<8x128xbf16> to vector<1x8x128xbf16>
    tpu.vector_store %arg7[%342, %c0_150, %c0_151], %345 {strides = array<i32>} : memref<8x8x128xbf16, #tpu.memory_space<vmem>>, vector<1x8x128xbf16>,
    %c8_i32_152 = arith.constant 8 : i32
    %c0_i32_153 = arith.constant 0 : i32
    %346 = arith.cmpi eq, %arg0, %c0_i32_153 : i32
    %347 = arith.extui %346 : i1 to i32
    %c0_i32_154 = arith.constant 0 : i32
    %348 = arith.cmpi ne, %347, %c0_i32_154 : i32
    scf.if %348 {
      %c0_155 = arith.constant 0 : index
      %c0_156 = arith.constant 0 : index
      %349 = vector.load %arg10[%c0_155, %c0_156] : memref<8x128xf32, #tpu.memory_space<vmem>>, vector<8x128xf32>
      %c0_157 = arith.constant 0 : index
      %c0_158 = arith.constant 0 : index
      %350 = vector.load %arg8[%c0_157, %c0_158] : memref<8x128xf32, #tpu.memory_space<vmem>>, vector<8x128xf32>
      tpu.vector_store %arg8[%c0_157, %c0_158], %349 {strides = array<i32>} : memref<8x128xf32, #tpu.memory_space<vmem>>, vector<8x128xf32>,
      %c0_159 = arith.constant 0 : index
      %c0_160 = arith.constant 0 : index
      %351 = vector.load %arg11[%c0_159, %c0_160] : memref<8x128xf32, #tpu.memory_space<vmem>>, vector<8x128xf32>
      %c0_161 = arith.constant 0 : index
      %c0_162 = arith.constant 0 : index
      %352 = vector.load %arg9[%c0_161, %c0_162] : memref<8x128xf32, #tpu.memory_space<vmem>>, vector<8x128xf32>
      tpu.vector_store %arg9[%c0_161, %c0_162], %351 {strides = array<i32>} : memref<8x128xf32, #tpu.memory_space<vmem>>, vector<8x128xf32>,
    } else {
    }
    return
  }
  func.func @transform_0(%arg0: i32) -> (i32, i32) {
    %c0_i32 = arith.constant 0 : i32
    %c0_i32_0 = arith.constant 0 : i32
    return %arg0, %c0_i32 : i32, i32
  }
  func.func @transform_1(%arg0: i32) -> (i32, i32) {
    %c0_i32 = arith.constant 0 : i32
    %c0_i32_0 = arith.constant 0 : i32
    %c0_i32_1 = arith.constant 0 : i32
    return %c0_i32, %c0_i32_0 : i32, i32
  }
  func.func @transform_2(%arg0: i32) -> (i32, i32) {
    %c0_i32 = arith.constant 0 : i32
    %c0_i32_0 = arith.constant 0 : i32
    %c0_i32_1 = arith.constant 0 : i32
    return %c0_i32, %c0_i32_0 : i32, i32
  }
  func.func @transform_3(%arg0: i32) -> (i32, i32) {
    %c0_i32 = arith.constant 0 : i32
    %c0_i32_0 = arith.constant 0 : i32
    %c0_i32_1 = arith.constant 0 : i32
    return %c0_i32, %c0_i32_0 : i32, i32
  }
  func.func @transform_4(%arg0: i32) -> (i32, i32) {
    %c0_i32 = arith.constant 0 : i32
    %c0_i32_0 = arith.constant 0 : i32
    %c0_i32_1 = arith.constant 0 : i32
    return %c0_i32, %c0_i32_0 : i32, i32
  }
  func.func @transform_5(%arg0: i32) -> (i32, i32) {
    %c0_i32 = arith.constant 0 : i32
    %c0_i32_0 = arith.constant 0 : i32
    %c0_i32_1 = arith.constant 0 : i32
    return %c0_i32, %c0_i32_0 : i32, i32
  }
  func.func @transform_6(%arg0: i32) -> (i32, i32, i32) {
    %c0_i32 = arith.constant 0 : i32
    %c0_i32_0 = arith.constant 0 : i32
    %c0_i32_1 = arith.constant 0 : i32
    return %arg0, %c0_i32, %c0_i32_0 : i32, i32, i32
  }
  func.func @transform_7(%arg0: i32) -> (i32, i32) {
    %c0_i32 = arith.constant 0 : i32
    %c0_i32_0 = arith.constant 0 : i32
    %c0_i32_1 = arith.constant 0 : i32
    return %c0_i32, %c0_i32_0 : i32, i32
  }
  func.func @transform_8(%arg0: i32) -> (i32, i32) {
    %c0_i32 = arith.constant 0 : i32
    %c0_i32_0 = arith.constant 0 : i32
    %c0_i32_1 = arith.constant 0 : i32
    return %c0_i32, %c0_i32_0 : i32, i32
  }
}

</mosaic_0001>

<bundles_post_ra>
// kernel: tpu_custom_call.1
= control target key start
LH: loop header
LB: loop body
LE: loop exit
PB: predicated region body
PF: predicated region fallthrough
CT: control target
= control target key end

     0   :  { %14 = vsyncpa [#allocation6], 0  ;;  %s4592_s0 = inlined_call_operand.hbm [shape: bf16[64,128], index: 0, kind: input, shape index: {}]   ;;  %s4593_s1 = inlined_call_operand.hbm [shape: bf16[128,512], index: 1, kind: input, shape index: {}]   ;;  %s4594_s2 = inlined_call_operand.hbm [shape: bf16[128,512], index: 2, kind: input, shape index: {}]   ;;  %s4595_s3 = inlined_call_operand.hbm [shape: f32[1,512], index: 3, kind: input, shape index: {}]   ;;  %s4596_s4 = inlined_call_operand.vmem [shape: f32[8,128], index: 4, kind: input, shape index: {}]   ;;  %s4597_s5 = inlined_call_operand.vmem [shape: f32[8,128], index: 5, kind: input, shape index: {}]   ;;  %s4598_s6 = inlined_call_operand.hbm [shape: bf16[8,8,128], index: 6, kind: output, shape index: {0}]   ;;  %s4599_s7 = inlined_call_operand.hbm [shape: f32[8,128], index: 7, kind: output, shape index: {1}]   ;;  %s4600_s8 = inlined_call_operand.hbm [shape: f32[8,128], index: 8, kind: output, shape index: {2}]  }
   0x1   :  { %15 = vsyncpa [#allocation9], 0 }
   0x2   :  { %16 = vsyncpa [#allocation12], 0 }
   0x3   :  { %17 = vsyncpa [#allocation7], 0 }
   0x4   :  { %18 = vsyncpa [#allocation15], 0  ;;  %s3877_s27 = smov [#allocation8]   ;;  %s3713_s9 = scalar_lea.hbm %s4593_s1, 4096 }
   0x5   :  { %s36_s28 = sshll.u32 %s3877_s27, 4  ;;  %p3714_p0 = scmp.ne.s32.totalorder %s4593_s1, %s3713_s9  ;;  %s37_s28 = int_to_ptr.vmem [resolvable:$true] %s36_s28 }
   0x6   :  { %p3717_p1 = scmp.lt.u32.totalorder %s3713_s9, %s4593_s1 }
   0x8   :  { %p3719_p2 = pnand %p3717_p1, %p3714_p0 }
   0xa   :  { %3722 = shalt.err (!%p3719_p2)
}
   0xb   :  { %s3723_s14 = scalar_lea.vmem %s37_s28, 4096  ;;  %p3728_p4 = scmp.lt.s32.totalorder %s37_s28, %s37_s28 }
   0xc   :  { %p3724_p3 = scmp.ne.s32.totalorder %s37_s28, %s3723_s14  ;;  %p3729_p5 = scmp.lt.s32.totalorder %s3723_s14, %s3723_s14 }
   0xe   :  { %p3730_p6 = por %p3729_p5, %p3728_p4 }
  0x10   :  { %p3731_p7 = pnand %p3730_p6, %p3724_p3 }
  0x12   :  { %3734 = shalt.err (!%p3731_p7)
}
  0x13   :  { %s3878_s15 = smov 256   ;;  %s3879_s16 = smov 16  }
  0x14   :  { %42 = dma.hbm_to_vmem [thread:$0]  %s4593_s1, 4096, %s37_s28, [#allocation9], %s3878_s15, %s3878_s15, %s3879_s16  }
  0x15   :  { %s3880_s19 = smov [#allocation5]   ;;  %s3735_s23 = scalar_lea.hbm %s4592_s0, 512 }
  0x16   :  { %s24_s20 = sshll.u32 %s3880_s19, 4  ;;  %p3736_p8 = scmp.ne.s32.totalorder %s4592_s0, %s3735_s23  ;;  %s25_s20 = int_to_ptr.vmem [resolvable:$true] %s24_s20 }
  0x17   :  { %p3739_p9 = scmp.lt.u32.totalorder %s3735_s23, %s4592_s0 }
  0x19   :  { %p3741_p10 = pnand %p3739_p9, %p3736_p8 }
  0x1b   :  { %3744 = shalt.err (!%p3741_p10)
}
  0x1c   :  { %s3745_s29 = scalar_lea.vmem %s25_s20, 512  ;;  %p3750_p12 = scmp.lt.s32.totalorder %s25_s20, %s25_s20 }
  0x1d   :  { %p3746_p11 = scmp.ne.s32.totalorder %s25_s20, %s3745_s29  ;;  %p3751_p13 = scmp.lt.s32.totalorder %s3745_s29, %s3745_s29 }
  0x1f   :  { %p3752_p0 = por %p3751_p13, %p3750_p12 }
  0x21   :  { %p3753_p1 = pnand %p3752_p0, %p3746_p11 }
  0x23   :  { %3756 = shalt.err (!%p3753_p1)
}
  0x24   :  { %s3881_s1 = smov 64   ;;  %s3882_s28 = smov 4  }
  0x25   :  { %30 = dma.hbm_to_vmem [thread:$0]  %s4592_s0, 512, %s25_s20, [#allocation6], %s3881_s1, %s3881_s1, %s3882_s28  }
  0x26   :  { %s3883_s10 = smov [#allocation10]   ;;  %s3884_s12 = smov [#allocation11]  }
  0x27   :  { %s48_s11 = sshll.u32 %s3883_s10, 4  ;;  %s61_s13 = sshll.u32 %s3884_s12, 4  ;;  %s49_s11 = int_to_ptr.vmem [resolvable:$true] %s48_s11  ;;  %s62_s13 = int_to_ptr.vmem [resolvable:$true] %s61_s13 }
  0x28   :  { %s3757_s18 = scalar_lea.hbm %s4594_s2, 4096 }
  0x29   :  { %p3758_p2 = scmp.ne.s32.totalorder %s4594_s2, %s3757_s18  ;;  %p3761_p3 = scmp.lt.u32.totalorder %s3757_s18, %s4594_s2 }
  0x2b   :  { %p3763_p4 = pnand %p3761_p3, %p3758_p2 }
  0x2d   :  { %3766 = shalt.err (!%p3763_p4)
}
  0x2e   :  { %s3767_s0 = scalar_lea.vmem %s49_s11, 4096  ;;  %p3772_p6 = scmp.lt.s32.totalorder %s49_s11, %s49_s11 }
  0x2f   :  { %p3768_p5 = scmp.ne.s32.totalorder %s49_s11, %s3767_s0  ;;  %p3773_p7 = scmp.lt.s32.totalorder %s3767_s0, %s3767_s0 }
  0x31   :  { %p3774_p8 = por %p3773_p7, %p3772_p6 }
  0x33   :  { %p3775_p9 = pnand %p3774_p8, %p3768_p5 }
  0x35   :  { %3778 = shalt.err (!%p3775_p9)
}
  0x36   :  { %54 = dma.hbm_to_vmem [thread:$0]  %s4594_s2, 4096, %s49_s11, [#allocation9], %s3878_s15, %s3878_s15, %s3879_s16  }
  0x37   :  { %s3779_s27 = scalar_lea.hbm %s4595_s3, 64 }
  0x38   :  { %p3780_p10 = scmp.ne.s32.totalorder %s4595_s3, %s3779_s27  ;;  %p3783_p11 = scmp.lt.u32.totalorder %s3779_s27, %s4595_s3 }
  0x3a   :  { %p3785_p12 = pnand %p3783_p11, %p3780_p10 }
  0x3c   :  { %3788 = shalt.err (!%p3785_p12)
}
  0x3d   :  { %s3789_s12 = scalar_lea.vmem %s62_s13, 64  ;;  %p3794_p0 = scmp.lt.s32.totalorder %s62_s13, %s62_s13 }
  0x3e   :  { %p3790_p13 = scmp.ne.s32.totalorder %s62_s13, %s3789_s12  ;;  %p3795_p1 = scmp.lt.s32.totalorder %s3789_s12, %s3789_s12 }
  0x40   :  { %p3796_p2 = por %p3795_p1, %p3794_p0 }
  0x42   :  { %p3797_p3 = pnand %p3796_p2, %p3790_p13 }
  0x44   :  { %3800 = shalt.err (!%p3797_p3)
}
  0x45   :  { %64 = dma.hbm_to_vmem [thread:$0]  %s4595_s3, 64, %s62_s13, [#allocation12]  }
  0x46   :  { %3867 = dma.done.wait [#allocation6], 512  }
  0x47   :  { %3868 = vsyncadd [#allocation6], 4294966784 }
  0x48   :  { %3869 = dma.done.wait [#allocation9], 8192  }
  0x49   :  { %3870 = vsyncadd [#allocation9], 4294959104 }
  0x4a   :  { %3871 = dma.done.wait [#allocation12], 64  }
  0x4b   :  { %3872 = vsyncadd [#allocation12], 4294967232  ;;  %v4601_v0 = vmov 0   ;;  %v3437_v1 = vld [vmem:[#allocation8 + $0x4] ss:$16 sps:$4 sm:$0xff]   ;;  %v3498_v44 = vld [vmem:[#allocation5 + $0x8] sm:$0xff]  }
  0x4c   :  { %368 = vmatprep.mubr.bf16.mxu0 %v4601_v0  ;;  %441 = vmatprep.mubr.bf16.mxu1 %v4601_v0  ;;  %v3439_v2 = vld [vmem:[#allocation8 + $0xc] ss:$16 sps:$4 sm:$0xff]   ;;  %v3441_v3 = vld [vmem:[#allocation8] ss:$16 sps:$4 sm:$0xff]   ;;  %v3442_v4 = vld [vmem:[#allocation8 + $0x8] ss:$16 sps:$4 sm:$0xff]  }
  0x4d   :  { %336 = vmatprep.subr.bf16.mxu0 %v3437_v1  ;;  %409 = vmatprep.subr.bf16.mxu1 %v3439_v2  ;;  %v3443_v5 = vld [vmem:[#allocation8 + $0x24] ss:$16 sps:$4 sm:$0xff]   ;;  %v3445_v6 = vld [vmem:[#allocation8 + $0x2c] ss:$16 sps:$4 sm:$0xff]   ;;  %v3447_v7 = vld [vmem:[#allocation8 + $0x20] ss:$16 sps:$4 sm:$0xff]  }
  0x4e   :  { %337 = vmatpush1.bf16.msra.mxu0 %v3441_v3  ;;  %410 = vmatpush1.bf16.msra.mxu1 %v3442_v4  ;;  %v3448_v8 = vld [vmem:[#allocation8 + $0x28] ss:$16 sps:$4 sm:$0xff]   ;;  %v3449_v9 = vld [vmem:[#allocation8 + $0x44] ss:$16 sps:$4 sm:$0xff]   ;;  %v3451_v10 = vld [vmem:[#allocation8 + $0x4c] ss:$16 sps:$4 sm:$0xff]  }
  0x4f   :  { %338 = vmatprep.subr.bf16.mxu0 %v3443_v5  ;;  %411 = vmatprep.subr.bf16.mxu1 %v3445_v6  ;;  %v3453_v11 = vld [vmem:[#allocation8 + $0x40] ss:$16 sps:$4 sm:$0xff]   ;;  %v3454_v12 = vld [vmem:[#allocation8 + $0x48] ss:$16 sps:$4 sm:$0xff]   ;;  %v3455_v13 = vld [vmem:[#allocation8 + $0x64] ss:$16 sps:$4 sm:$0xff]  }
  0x50   :  { %v3457_v14 = vld [vmem:[#allocation8 + $0x6c] ss:$16 sps:$4 sm:$0xff]   ;;  %v3459_v15 = vld [vmem:[#allocation8 + $0x60] ss:$16 sps:$4 sm:$0xff]   ;;  %v3460_v16 = vld [vmem:[#allocation8 + $0x68] ss:$16 sps:$4 sm:$0xff]  }
  0x51   :  { %v3461_v17 = vld [vmem:[#allocation8 + $0x84] ss:$16 sps:$4 sm:$0xff]   ;;  %v3463_v18 = vld [vmem:[#allocation8 + $0x8c] ss:$16 sps:$4 sm:$0xff]   ;;  %v3465_v19 = vld [vmem:[#allocation8 + $0x80] ss:$16 sps:$4 sm:$0xff]  }
  0x52   :  { %339 = vmatpush1.bf16.msra.mxu0 %v3447_v7  ;;  %412 = vmatpush1.bf16.msra.mxu1 %v3448_v8  ;;  %v3466_v20 = vld [vmem:[#allocation8 + $0x88] ss:$16 sps:$4 sm:$0xff]   ;;  %v3467_v21 = vld [vmem:[#allocation8 + $0xa4] ss:$16 sps:$4 sm:$0xff]   ;;  %v3469_v22 = vld [vmem:[#allocation8 + $0xac] ss:$16 sps:$4 sm:$0xff]   ;;  %v132_v8 = vlaneseq }
  0x53   :  { %340 = vmatprep.subr.bf16.mxu0 %v3449_v9  ;;  %413 = vmatprep.subr.bf16.mxu1 %v3451_v10  ;;  %v3471_v23 = vld [vmem:[#allocation8 + $0xa0] ss:$16 sps:$4 sm:$0xff]   ;;  %v3472_v24 = vld [vmem:[#allocation8 + $0xa8] ss:$16 sps:$4 sm:$0xff]   ;;  %v3473_v25 = vld [vmem:[#allocation8 + $0xc4] ss:$16 sps:$4 sm:$0xff]  }
  0x54   :  { %v3475_v26 = vld [vmem:[#allocation8 + $0xcc] ss:$16 sps:$4 sm:$0xff]   ;;  %v3477_v27 = vld [vmem:[#allocation8 + $0xc0] ss:$16 sps:$4 sm:$0xff]   ;;  %v3478_v28 = vld [vmem:[#allocation8 + $0xc8] ss:$16 sps:$4 sm:$0xff]  }
  0x55   :  { %v3479_v29 = vld [vmem:[#allocation8 + $0xe4] ss:$16 sps:$4 sm:$0xff]   ;;  %v3481_v30 = vld [vmem:[#allocation8 + $0xec] ss:$16 sps:$4 sm:$0xff]   ;;  %v3483_v31 = vld [vmem:[#allocation8 + $0xe0] ss:$16 sps:$4 sm:$0xff]  }
  0x56   :  { %341 = vmatpush1.bf16.msra.mxu0 %v3453_v11  ;;  %414 = vmatpush1.bf16.msra.mxu1 %v3454_v12  ;;  %v3484_v32 = vld [vmem:[#allocation8 + $0xe8] ss:$16 sps:$4 sm:$0xff]   ;;  %v3993_v33 = vld [vmem:[#allocation10 + $0x4] ss:$16 sps:$4 sm:$0xff]   ;;  %v3995_v34 = vld [vmem:[#allocation10 + $0xc] ss:$16 sps:$4 sm:$0xff]  }
  0x57   :  { %342 = vmatprep.subr.bf16.mxu0 %v3455_v13  ;;  %415 = vmatprep.subr.bf16.mxu1 %v3457_v14  ;;  %v3485_v35 = vld [vmem:[#allocation5] sm:$0xff]   ;;  %v3999_v37 = vld [vmem:[#allocation10 + $0x8] ss:$16 sps:$4 sm:$0xff]   ;;  %v4005_v39 = vld [vmem:[#allocation10 + $0x2c] ss:$16 sps:$4 sm:$0xff]   ;;  %v133_v9 = vshrl.u32 %v132_v8, 7 }
  0x58   :  { %v3997_v36 = vld [vmem:[#allocation10] ss:$16 sps:$4 sm:$0xff]   ;;  %v4003_v38 = vld [vmem:[#allocation10 + $0x24] ss:$16 sps:$4 sm:$0xff]   ;;  %v4011_v41 = vld [vmem:[#allocation10 + $0x28] ss:$16 sps:$4 sm:$0xff]  }
  0x59   :  { %v4007_v40 = vld [vmem:[#allocation10 + $0x20] ss:$16 sps:$4 sm:$0xff]   ;;  %v4015_v42 = vld [vmem:[#allocation10 + $0x44] ss:$16 sps:$4 sm:$0xff]   ;;  %v4017_v43 = vld [vmem:[#allocation10 + $0x4c] ss:$16 sps:$4 sm:$0xff]  }
  0x5a   :  { %343 = vmatpush1.bf16.msra.mxu0 %v3459_v15  ;;  %416 = vmatpush1.bf16.msra.mxu1 %v3460_v16  ;;  %v4021_v45 = vld [vmem:[#allocation10 + $0x40] ss:$16 sps:$4 sm:$0xff]   ;;  %v4023_v46 = vld [vmem:[#allocation10 + $0x48] ss:$16 sps:$4 sm:$0xff]   ;;  %v4027_v47 = vld [vmem:[#allocation10 + $0x64] ss:$16 sps:$4 sm:$0xff]  }
  0x5b   :  { %344 = vmatprep.subr.bf16.mxu0 %v3461_v17  ;;  %417 = vmatprep.subr.bf16.mxu1 %v3463_v18  ;;  %v4031_v48 = vld [vmem:[#allocation10 + $0x6c] ss:$16 sps:$4 sm:$0xff]   ;;  %v4033_v49 = vld [vmem:[#allocation10 + $0x60] ss:$16 sps:$4 sm:$0xff]   ;;  %v4035_v50 = vld [vmem:[#allocation10 + $0x68] ss:$16 sps:$4 sm:$0xff]  }
  0x5c   :  { %v4039_v51 = vld [vmem:[#allocation10 + $0x84] ss:$16 sps:$4 sm:$0xff]   ;;  %v4043_v52 = vld [vmem:[#allocation10 + $0x8c] ss:$16 sps:$4 sm:$0xff]   ;;  %v4047_v54 = vld [vmem:[#allocation10 + $0x80] ss:$16 sps:$4 sm:$0xff]  }
  0x5d   :  { %v3511_v53 = vld [vmem:[#allocation5 + $0x10] sm:$0xff]   ;;  %v4049_v55 = vld [vmem:[#allocation10 + $0x88] ss:$16 sps:$4 sm:$0xff]   ;;  %v4053_v57 = vld [vmem:[#allocation10 + $0xac] ss:$16 sps:$4 sm:$0xff]   ;;  %v142_v10 = vsub.s32 2, %v133_v9 }
  0x5e   :  { %345 = vmatpush1.bf16.msra.mxu0 %v3465_v19  ;;  %418 = vmatpush1.bf16.msra.mxu1 %v3466_v20  ;;  %v4051_v56 = vld [vmem:[#allocation10 + $0xa4] ss:$16 sps:$4 sm:$0xff]   ;;  %v4059_v58 = vld [vmem:[#allocation10 + $0xa0] ss:$16 sps:$4 sm:$0xff]   ;;  %v4061_v59 = vld [vmem:[#allocation10 + $0xa8] ss:$16 sps:$4 sm:$0xff]  }
  0x5f   :  { %346 = vmatprep.subr.bf16.mxu0 %v3467_v21  ;;  %419 = vmatprep.subr.bf16.mxu1 %v3469_v22  ;;  %v4063_v60 = vld [vmem:[#allocation10 + $0xc4] ss:$16 sps:$4 sm:$0xff]   ;;  %v4065_v61 = vld [vmem:[#allocation10 + $0xcc] ss:$16 sps:$4 sm:$0xff]   ;;  %v4073_v63 = vld [vmem:[#allocation10 + $0xc0] ss:$16 sps:$4 sm:$0xff]  }
  0x60   :  { %v3524_v62 = vld [vmem:[#allocation5 + $0x18] sm:$0xff]   ;;  %v4077_v2 = vld [vmem:[#allocation10 + $0xe4] ss:$16 sps:$4 sm:$0xff]   ;;  %v4087_v4 = vld [vmem:[#allocation10 + $0xe0] ss:$16 sps:$4 sm:$0xff]   ;;  %v146_v11 = vsub.s32 3, %v133_v9 }
  0x61   :  { %v4075_v1 = vld [vmem:[#allocation10 + $0xc8] ss:$16 sps:$4 sm:$0xff]   ;;  %v4079_v3 = vld [vmem:[#allocation10 + $0xec] ss:$16 sps:$4 sm:$0xff]   ;;  %v86_v6 = vld [vmem:[%s4596_s4] sm:$0xff]  ;;  %v134_v12 = vsub.s32 0, %v133_v9 }
  0x62   :  { %347 = vmatpush1.bf16.msra.mxu0 %v3471_v23  ;;  %420 = vmatpush1.bf16.msra.mxu1 %v3472_v24  ;;  %v4089_v5 = vld [vmem:[#allocation10 + $0xe8] ss:$16 sps:$4 sm:$0xff]   ;;  %v523_v7 = vpack.c.bf16 %v86_v6, %v86_v6  ;;  %v130_v13 = vld [vmem:[#allocation11] sm:$0xf]  ;;  %v138_v14 = vsub.s32 1, %v133_v9  ;;  %s3887_s14 = smov [#allocation16]  }
  0x63   :  { %348 = vmatprep.subr.bf16.mxu0 %v3473_v25  ;;  %421 = vmatprep.subr.bf16.mxu1 %v3475_v26  ;;  %v4136_v15 = vrot.slane %v130_v13, %v142_v10  ;;  %v4142_v18 = vrot.slane %v130_v13, %v146_v11  ;;  %v135_v19 = vrot.slane %v130_v13, %v134_v12  ;;  %s3084_s17 = sshll.u32 %s3887_s14, 4  ;;  %s3888_s18 = smov [#allocation13]   ;;  %s4539_s17 = int_to_ptr.vmem [resolvable:$true] %s3084_s17 }
  0x64   :  { %v139_v22 = vrot.slane %v130_v13, %v138_v14  ;;  %s3061_s19 = sshll.u32 %s3888_s18, 4  ;;  %s4541_s19 = int_to_ptr.vmem [resolvable:$true] %s3061_s19 }
  0x66   :  { %349 = vmatpush1.bf16.msra.mxu0 %v3477_v27  ;;  %422 = vmatpush1.bf16.msra.mxu1 %v3478_v28 }
  0x67   :  { %350 = vmatprep.subr.bf16.mxu0 %v3479_v29  ;;  %423 = vmatprep.subr.bf16.mxu1 %v3481_v30 }
  0x6a   :  { %351 = vmatpush1.bf16.msra.mxu0 %v3483_v31  ;;  %424 = vmatpush1.bf16.msra.mxu1 %v3484_v32 }
  0x6b   :  { %716 = vmatprep.subr.bf16.mxu0 %v3993_v33  ;;  %757 = vmatprep.subr.bf16.mxu1 %v3995_v34 }
  0x6d   :  { %369 = vmatmul.mubr.bf16.vlgmr.msra.gmra.mrb[0].mxu0 %v3485_v35  ;;  %442 = vmatmul.mubr.bf16.vlgmr.msra.gmra.mrb[0].mxu1 %v3485_v35 }
  0x6e   :  { %717 = vmatpush1.bf16.msra.mxu0 %v3997_v36  ;;  %758 = vmatpush1.bf16.msra.mxu1 %v3999_v37 }
  0x6f   :  { %718 = vmatprep.subr.bf16.mxu0 %v4003_v38  ;;  %759 = vmatprep.subr.bf16.mxu1 %v4005_v39 }
  0x70   :  { %378 = vmatprep.mubr.bf16.mxu0 %v4601_v0  ;;  %451 = vmatprep.mubr.bf16.mxu1 %v4601_v0 }
  0x72   :  { %719 = vmatpush1.bf16.msra.mxu0 %v4007_v40  ;;  %760 = vmatpush1.bf16.msra.mxu1 %v4011_v41 }
  0x73   :  { %720 = vmatprep.subr.bf16.mxu0 %v4015_v42  ;;  %761 = vmatprep.subr.bf16.mxu1 %v4017_v43 }
  0x75   :  { %379 = vmatmul.mubr.bf16.gmra.mrb[4].mxu0 %v3498_v44  ;;  %452 = vmatmul.mubr.bf16.gmra.mrb[4].mxu1 %v3498_v44 }
  0x76   :  { %721 = vmatpush1.bf16.msra.mxu0 %v4021_v45  ;;  %762 = vmatpush1.bf16.msra.mxu1 %v4023_v46 }
  0x77   :  { %722 = vmatprep.subr.bf16.mxu0 %v4027_v47  ;;  %763 = vmatprep.subr.bf16.mxu1 %v4031_v48 }
  0x78   :  { %388 = vmatprep.mubr.bf16.mxu0 %v4601_v0  ;;  %461 = vmatprep.mubr.bf16.mxu1 %v4601_v0 }
  0x7a   :  { %723 = vmatpush1.bf16.msra.mxu0 %v4033_v49  ;;  %764 = vmatpush1.bf16.msra.mxu1 %v4035_v50 }
  0x7b   :  { %724 = vmatprep.subr.bf16.mxu0 %v4039_v51  ;;  %765 = vmatprep.subr.bf16.mxu1 %v4043_v52 }
  0x7d   :  { %389 = vmatmul.mubr.bf16.gmra.mrb[8].mxu0 %v3511_v53  ;;  %462 = vmatmul.mubr.bf16.gmra.mrb[8].mxu1 %v3511_v53 }
  0x7e   :  { %725 = vmatpush1.bf16.msra.mxu0 %v4047_v54  ;;  %766 = vmatpush1.bf16.msra.mxu1 %v4049_v55 }
  0x7f   :  { %726 = vmatprep.subr.bf16.mxu0 %v4051_v56  ;;  %767 = vmatprep.subr.bf16.mxu1 %v4053_v57 }
  0x80   :  { %398 = vmatprep.mubr.bf16.mxu0 %v4601_v0  ;;  %471 = vmatprep.mubr.bf16.mxu1 %v4601_v0 }
  0x82   :  { %727 = vmatpush1.bf16.msra.mxu0 %v4059_v58  ;;  %768 = vmatpush1.bf16.msra.mxu1 %v4061_v59 }
  0x83   :  { %728 = vmatprep.subr.bf16.mxu0 %v4063_v60  ;;  %769 = vmatprep.subr.bf16.mxu1 %v4065_v61 }
  0x85   :  { %399 = vmatmul.mubr.bf16.gmra.mrb[12].mxu0 %v3524_v62  ;;  %472 = vmatmul.mubr.bf16.gmra.mrb[12].mxu1 %v3524_v62 }
  0x86   :  { %729 = vmatpush1.bf16.msra.mxu0 %v4073_v63  ;;  %770 = vmatpush1.bf16.msra.mxu1 %v4075_v1 }
  0x87   :  { %730 = vmatprep.subr.bf16.mxu0 %v4077_v2  ;;  %771 = vmatprep.subr.bf16.mxu1 %v4079_v3 }
  0x88   :  { %748 = vmatprep.mubr.bf16.mxu0 %v4601_v0  ;;  %789 = vmatprep.mubr.bf16.mxu1 %v4601_v0 }
  0x8a   :  { %731 = vmatpush1.bf16.msra.mxu0 %v4087_v4  ;;  %772 = vmatpush1.bf16.msra.mxu1 %v4089_v5 }
  0x8b   :  { %1032 = vmatprep.subr.bf16.mxu0 %v3993_v33  ;;  %1073 = vmatprep.subr.bf16.mxu1 %v3995_v34 }
  0x8d   :  { %749 = vmatmul.mubr.bf16.vlgmr.msra.gmra.mrb[16].mxu0 %v523_v7  ;;  %790 = vmatmul.mubr.bf16.vlgmr.msra.gmra.mrb[16].mxu1 %v523_v7 }
  0x8e   :  { %1033 = vmatpush1.bf16.msra.mxu0 %v3997_v36  ;;  %1074 = vmatpush1.bf16.msra.mxu1 %v3999_v37 }
  0x8f   :  { %1034 = vmatprep.subr.bf16.mxu0 %v4003_v38  ;;  %1075 = vmatprep.subr.bf16.mxu1 %v4005_v39 }
  0x90   :  { %1064 = vmatprep.mubr.bf16.mxu0 %v4601_v0  ;;  %1105 = vmatprep.mubr.bf16.mxu1 %v4601_v0 }
  0x92   :  { %1035 = vmatpush1.bf16.msra.mxu0 %v4007_v40  ;;  %1076 = vmatpush1.bf16.msra.mxu1 %v4011_v41 }
  0x93   :  { %1036 = vmatprep.subr.bf16.mxu0 %v4015_v42  ;;  %1077 = vmatprep.subr.bf16.mxu1 %v4017_v43 }
  0x96   :  { %1037 = vmatpush1.bf16.msra.mxu0 %v4021_v45  ;;  %1078 = vmatpush1.bf16.msra.mxu1 %v4023_v46 }
  0x97   :  { %1038 = vmatprep.subr.bf16.mxu0 %v4027_v47  ;;  %1079 = vmatprep.subr.bf16.mxu1 %v4031_v48 }
  0x9a   :  { %1039 = vmatpush1.bf16.msra.mxu0 %v4033_v49  ;;  %1080 = vmatpush1.bf16.msra.mxu1 %v4035_v50 }
  0x9b   :  { %1040 = vmatprep.subr.bf16.mxu0 %v4039_v51  ;;  %1081 = vmatprep.subr.bf16.mxu1 %v4043_v52 }
  0x9e   :  { %1041 = vmatpush1.bf16.msra.mxu0 %v4047_v54  ;;  %1082 = vmatpush1.bf16.msra.mxu1 %v4049_v55 }
  0x9f   :  { %1042 = vmatprep.subr.bf16.mxu0 %v4051_v56  ;;  %1083 = vmatprep.subr.bf16.mxu1 %v4053_v57 }
  0xa2   :  { %1043 = vmatpush1.bf16.msra.mxu0 %v4059_v58  ;;  %1084 = vmatpush1.bf16.msra.mxu1 %v4061_v59 }
  0xa3   :  { %1044 = vmatprep.subr.bf16.mxu0 %v4063_v60  ;;  %1085 = vmatprep.subr.bf16.mxu1 %v4065_v61 }
  0xa6   :  { %1045 = vmatpush1.bf16.msra.mxu0 %v4073_v63  ;;  %1086 = vmatpush1.bf16.msra.mxu1 %v4075_v1 }
  0xa7   :  { %1046 = vmatprep.subr.bf16.mxu0 %v4077_v2  ;;  %1087 = vmatprep.subr.bf16.mxu1 %v4079_v3 }
  0xaa   :  { %1047 = vmatpush1.bf16.msra.mxu0 %v4087_v4  ;;  %1088 = vmatpush1.bf16.msra.mxu1 %v4089_v5 }
  0xab   :  { %1349 = vmatprep.subr.bf16.mxu0 %v3993_v33  ;;  %1390 = vmatprep.subr.bf16.mxu1 %v3995_v34 }
 0x140   :  { %v4138_v16 = vpop.f32.mrb[0].mxu0  ;;  %v4140_v17 = vpop.f32.mrb[0].mxu1 }
 0x141   :  { %v372_v20 = vpop.f32.mrb[1].mxu0  ;;  %v445_v21 = vpop.f32.mrb[1].mxu1 }
 0x142   :  { %v374_v23 = vpop.f32.mrb[2].mxu0  ;;  %v447_v24 = vpop.f32.mrb[2].mxu1 }
 0x143   :  { %v4144_v25 = vadd.f32 %v374_v23, %v135_v19  ;;  %v376_v26 = vpop.f32.mrb[3].mxu0  ;;  %v4147_v27 = vadd.f32 %v447_v24, %v4136_v15  ;;  %v449_v28 = vpop.f32.mrb[3].mxu1 }
 0x144   :  { %v4149_v29 = vadd.f32 %v376_v26, %v139_v22  ;;  %v4152_v30 = vadd.f32 %v449_v28, %v4142_v18 }
 0x148   :  { %v380_v31 = vpop.f32.mrb[4].mxu0  ;;  %v453_v32 = vpop.f32.mrb[4].mxu1 }
 0x149   :  { %v4154_v35 = vadd.f32 %v380_v31, %v135_v19  ;;  %v382_v44 = vpop.f32.mrb[5].mxu0  ;;  %v4157_v53 = vadd.f32 %v453_v32, %v4136_v15  ;;  %v455_v62 = vpop.f32.mrb[5].mxu1 }
 0x14a   :  { %v4159_v6 = vadd.f32 %v382_v44, %v139_v22  ;;  %v384_v7 = vpop.f32.mrb[6].mxu0  ;;  %v4162_v8 = vadd.f32 %v455_v62, %v4142_v18  ;;  %v457_v9 = vpop.f32.mrb[6].mxu1 }
 0x14b   :  { %v4164_v10 = vadd.f32 %v384_v7, %v135_v19  ;;  %v386_v11 = vpop.f32.mrb[7].mxu0  ;;  %v4167_v12 = vadd.f32 %v457_v9, %v4136_v15  ;;  %v459_v13 = vpop.f32.mrb[7].mxu1 }
 0x14c   :  { %4603 = vst [vmem:[#allocation22_spill] sm:$0xff] %v4162_v8  ;;  %v4169_v14 = vadd.f32 %v386_v11, %v139_v22  ;;  %v4172_v23 = vadd.f32 %v459_v13, %v4142_v18 }
 0x14d   :  { %4604 = vst [vmem:[#allocation23_spill] sm:$0xff] %v4164_v10  ;;  %4605 = vst [vmem:[#allocation24_spill] sm:$0xff] %v4167_v12 }
 0x14e   :  { %4606 = vst [vmem:[#allocation25_spill] sm:$0xff] %v4169_v14  ;;  %4607 = vst [vmem:[#allocation26_spill] sm:$0xff] %v4172_v23 }
 0x150   :  { %v390_v24 = vpop.f32.mrb[8].mxu0  ;;  %v463_v26 = vpop.f32.mrb[8].mxu1 }
 0x151   :  { %v4174_v28 = vadd.f32 %v390_v24, %v135_v19  ;;  %v392_v31 = vpop.f32.mrb[9].mxu0  ;;  %v4177_v32 = vadd.f32 %v463_v26, %v4136_v15  ;;  %v465_v44 = vpop.f32.mrb[9].mxu1 }
 0x152   :  { %v4179_v62 = vadd.f32 %v392_v31, %v139_v22  ;;  %v394_v7 = vpop.f32.mrb[10].mxu0  ;;  %v4182_v9 = vadd.f32 %v465_v44, %v4142_v18  ;;  %v467_v11 = vpop.f32.mrb[10].mxu1 }
 0x153   :  { %4608 = vst [vmem:[#allocation27_spill] sm:$0xff] %v4174_v28  ;;  %4609 = vst [vmem:[#allocation28_spill] sm:$0xff] %v4177_v32  ;;  %v4184_v0 = vadd.f32 %v394_v7, %v135_v19  ;;  %v396_v13 = vpop.f32.mrb[11].mxu0  ;;  %v4187_v23 = vadd.f32 %v467_v11, %v4136_v15  ;;  %v469_v24 = vpop.f32.mrb[11].mxu1 }
 0x154   :  { %4610 = vst [vmem:[#allocation29_spill] sm:$0xff] %v4179_v62  ;;  %4611 = vst [vmem:[#allocation30_spill] sm:$0xff] %v4182_v9  ;;  %v4189_v28 = vadd.f32 %v396_v13, %v139_v22  ;;  %v4192_v26 = vadd.f32 %v469_v24, %v4142_v18 }
 0x155   :  { %4612 = vst [vmem:[#allocation31_spill] sm:$0xff] %v4184_v0  ;;  %4613 = vst [vmem:[#allocation32_spill] sm:$0xff] %v4187_v23 }
 0x156   :  { %4614 = vst [vmem:[#allocation33_spill] sm:$0xff] %v4189_v28  ;;  %4615 = vst [vmem:[#allocation34_spill] sm:$0xff] %v4192_v26 }
 0x158   :  { %v400_v32 = vpop.f32.mrb[12].mxu0  ;;  %v473_v31 = vpop.f32.mrb[12].mxu1 }
 0x159   :  { %v4194_v62 = vadd.f32 %v400_v32, %v135_v19  ;;  %v402_v14 = vpop.f32.mrb[13].mxu0  ;;  %v4197_v44 = vadd.f32 %v473_v31, %v4136_v15  ;;  %v475_v7 = vpop.f32.mrb[13].mxu1 }
 0x15a   :  { %v4199_v0 = vadd.f32 %v402_v14, %v139_v22  ;;  %v404_v9 = vpop.f32.mrb[14].mxu0  ;;  %v4202_v11 = vadd.f32 %v475_v7, %v4142_v18  ;;  %v477_v13 = vpop.f32.mrb[14].mxu1  ;;  %v371_v14 = vadd.f32 %v4138_v16, %v135_v19  ;;  %v373_v7 = vadd.f32 %v372_v20, %v139_v22 }
 0x15b   :  { %4616 = vst [vmem:[#allocation35_spill] sm:$0xff] %v4194_v62  ;;  %4617 = vst [vmem:[#allocation36_spill] sm:$0xff] %v4197_v44  ;;  %v4204_v28 = vadd.f32 %v404_v9, %v135_v19  ;;  %v406_v24 = vpop.f32.mrb[15].mxu0  ;;  %v4207_v26 = vadd.f32 %v477_v13, %v4136_v15  ;;  %v479_v32 = vpop.f32.mrb[15].mxu1 }
 0x15c   :  { %4618 = vst [vmem:[#allocation37_spill] sm:$0xff] %v4199_v0  ;;  %4619 = vst [vmem:[#allocation38_spill] sm:$0xff] %v4202_v11  ;;  %v4209_v62 = vadd.f32 %v406_v24, %v139_v22  ;;  %v4212_v31 = vadd.f32 %v479_v32, %v4142_v18  ;;  %v444_v0 = vadd.f32 %v4140_v17, %v4136_v15  ;;  %v88_v22 = vld [vmem:[%s4597_s5] sm:$0xff]  ;;  %s3886_s5 = smov [#allocation14]  }
 0x15d   :  { %4620 = vst [vmem:[#allocation39_spill] sm:$0xff] %v4204_v28  ;;  %4621 = vst [vmem:[#allocation40_spill] sm:$0xff] %v4207_v26  ;;  %v446_v11 = vadd.f32 %v445_v21, %v4142_v18  ;;  %s3074_s13 = sshll.u32 %s3886_s5, 4  ;;  %s3075_s13 = int_to_ptr.vmem [resolvable:$true] %s3074_s13 }
 0x15e   :  { %4622 = vst [vmem:[#allocation41_spill] sm:$0xff] %v4209_v62  ;;  %4623 = vst [vmem:[#allocation42_spill] sm:$0xff] %v4212_v31  ;;  %s3801_s21 = scalar_lea.vmem %s3075_s13, 128  ;;  %p3806_p5 = scmp.lt.s32.totalorder %s3075_s13, %s3075_s13 }
 0x15f   :  { %p3802_p4 = scmp.ne.s32.totalorder %s3075_s13, %s3801_s21  ;;  %p3807_p6 = scmp.lt.s32.totalorder %s3801_s21, %s3801_s21 }
 0x160   :  { %v750_v9 = vpop.f32.mrb[16].mxu0  ;;  %v791_v28 = vpop.f32.mrb[16].mxu1 }
 0x161   :  { %v798_v44 = vadd.f32 %v750_v9, %v371_v14  ;;  %v800_v23 = vadd.f32 %v791_v28, %v444_v0  ;;  %v752_v13 = vpop.f32.mrb[17].mxu0  ;;  %v793_v26 = vpop.f32.mrb[17].mxu1  ;;  %v4624_v14 = vmov 0   ;;  %p3808_p7 = por %p3807_p6, %p3806_p5 }
 0x162   :  { %v799_v12 = vadd.f32 %v752_v13, %v373_v7  ;;  %v801_v24 = vadd.f32 %v793_v26, %v446_v11  ;;  %v754_v62 = vpop.f32.mrb[18].mxu0  ;;  %v795_v10 = vpop.f32.mrb[18].mxu1 }
 0x163   :  { %v3177_v32 = vmul.f32 -1.442695, %v798_v44  ;;  %v755_v31 = vpop.f32.mrb[19].mxu0  ;;  %v796_v8 = vpop.f32.mrb[19].mxu1  ;;  %p3809_p8 = pnand %p3808_p7, %p3802_p4 }
 0x164   :  { %v3178_v16 = vmul.f32 -1.442695, %v799_v12  ;;  %v3179_v15 = vmul.f32 -1.442695, %v801_v24 }
 0x165   :  { %3585 = vpow2.f32 %v3177_v32 }
 0x166   :  { %3587 = vpow2.f32 %v3178_v16 }
 0x167   :  { %3589 = vpow2.f32 %v3179_v15 }
 0x168   :  { %3591 = vtanh.f32 %v800_v23 }
 0x16f   :  { %v3586_v17 = vpop.eup %3585 }
 0x170   :  { %v3588_v19 = vpop.eup %3587  ;;  %v805_v18 = vadd.f32 1.0, %v3586_v17 }
 0x171   :  { %v811_v20 = vadd.f32 1.0, %v3588_v19  ;;  %v3590_v0 = vpop.eup %3589 }
 0x172   :  { %3593 = vrcp.f32 %v805_v18  ;;  %v3592_v21 = vpop.eup %3591  ;;  %v818_v28 = vadd.f32 1.0, %v3590_v0 }
 0x173   :  { %3595 = vrcp.f32 %v811_v20 }
 0x174   :  { %3597 = vrcp.f32 %v818_v28 }
 0x17c   :  { %v3594_v10 = vpop.eup %3593 }
 0x17d   :  { %v3596_v8 = vpop.eup %3595  ;;  %v822_v12 = vmul.f32 %v3594_v10, %v3592_v21 }
 0x17e   :  { %v821_v62 = vmul.f32 %v3596_v8, %v88_v22  ;;  %v3598_v23 = vpop.eup %3597 }
 0x180   :  { %v4221_v26 = vadd.f32 %v822_v12, %v821_v62 }
 0x182   :  { %3599 = vtanh.f32 %v4221_v26 }
 0x18c   :  { %v3600_v44 = vpop.eup %3599 }
 0x18d   :  { %v825_v11 = vmul.f32 %v3600_v44, %v3598_v23 }
 0x18f   :  { %v828_v31 = vpack.c.bf16 %v825_v11, %v825_v11 }
 0x191   :  { %829 = vst [vmem:[#allocation13] sm:$0xf] %v828_v31  ;;  %1065 = vmatmul.mubr.bf16.vlgmr.msra.gmra.mrb[20].mxu0 %v828_v31  ;;  %1106 = vmatmul.mubr.bf16.vlgmr.msra.gmra.mrb[20].mxu1 %v828_v31 }
 0x192   :  { %1350 = vmatpush1.bf16.msra.mxu0 %v3997_v36  ;;  %1391 = vmatpush1.bf16.msra.mxu1 %v3999_v37 }
 0x193   :  { %1351 = vmatprep.subr.bf16.mxu0 %v4003_v38  ;;  %1392 = vmatprep.subr.bf16.mxu1 %v4005_v39 }
 0x194   :  { %1381 = vmatprep.mubr.bf16.mxu0 %v4624_v14  ;;  %1422 = vmatprep.mubr.bf16.mxu1 %v4624_v14 }
 0x196   :  { %1352 = vmatpush1.bf16.msra.mxu0 %v4007_v40  ;;  %1393 = vmatpush1.bf16.msra.mxu1 %v4011_v41 }
 0x197   :  { %1353 = vmatprep.subr.bf16.mxu0 %v4015_v42  ;;  %1394 = vmatprep.subr.bf16.mxu1 %v4017_v43 }
 0x19a   :  { %1354 = vmatpush1.bf16.msra.mxu0 %v4021_v45  ;;  %1395 = vmatpush1.bf16.msra.mxu1 %v4023_v46 }
 0x19b   :  { %1355 = vmatprep.subr.bf16.mxu0 %v4027_v47  ;;  %1396 = vmatprep.subr.bf16.mxu1 %v4031_v48 }
 0x19e   :  { %1356 = vmatpush1.bf16.msra.mxu0 %v4033_v49  ;;  %1397 = vmatpush1.bf16.msra.mxu1 %v4035_v50 }
 0x19f   :  { %1357 = vmatprep.subr.bf16.mxu0 %v4039_v51  ;;  %1398 = vmatprep.subr.bf16.mxu1 %v4043_v52 }
 0x1a2   :  { %1358 = vmatpush1.bf16.msra.mxu0 %v4047_v54  ;;  %1399 = vmatpush1.bf16.msra.mxu1 %v4049_v55 }
 0x1a3   :  { %1359 = vmatprep.subr.bf16.mxu0 %v4051_v56  ;;  %1400 = vmatprep.subr.bf16.mxu1 %v4053_v57 }
 0x1a6   :  { %1360 = vmatpush1.bf16.msra.mxu0 %v4059_v58  ;;  %1401 = vmatpush1.bf16.msra.mxu1 %v4061_v59 }
 0x1a7   :  { %1361 = vmatprep.subr.bf16.mxu0 %v4063_v60  ;;  %1402 = vmatprep.subr.bf16.mxu1 %v4065_v61 }
 0x1aa   :  { %1362 = vmatpush1.bf16.msra.mxu0 %v4073_v63  ;;  %1403 = vmatpush1.bf16.msra.mxu1 %v4075_v1 }
 0x1ab   :  { %1363 = vmatprep.subr.bf16.mxu0 %v4077_v2  ;;  %1404 = vmatprep.subr.bf16.mxu1 %v4079_v3 }
 0x1ae   :  { %1364 = vmatpush1.bf16.msra.mxu0 %v4087_v4  ;;  %1405 = vmatpush1.bf16.msra.mxu1 %v4089_v5 }
 0x1af   :  { %1666 = vmatprep.subr.bf16.mxu0 %v3993_v33  ;;  %1707 = vmatprep.subr.bf16.mxu1 %v3995_v34 }
 0x264   :  { %v1066_v7 = vpop.f32.mrb[20].mxu0  ;;  %v1107_v9 = vpop.f32.mrb[20].mxu1 }
 0x265   :  { %v1114_v13 = vadd.f32 %v1066_v7, %v4144_v25  ;;  %v1116_v24 = vadd.f32 %v1107_v9, %v4147_v27  ;;  %v1068_v32 = vpop.f32.mrb[21].mxu0  ;;  %v1109_v16 = vpop.f32.mrb[21].mxu1 }
 0x266   :  { %v1115_v15 = vadd.f32 %v1068_v32, %v4149_v29  ;;  %v1117_v17 = vadd.f32 %v1109_v16, %v4152_v30  ;;  %v1070_v19 = vpop.f32.mrb[22].mxu0  ;;  %v1111_v18 = vpop.f32.mrb[22].mxu1  ;;  %v4320_v32 = vld [vmem:[#allocation10 + $0x24] ss:$16 sps:$4 sm:$0xff]   ;;  %v4322_v16 = vld [vmem:[#allocation10 + $0x2c] ss:$16 sps:$4 sm:$0xff]  }
 0x267   :  { %v3212_v20 = vmul.f32 -1.442695, %v1114_v13  ;;  %v1071_v0 = vpop.f32.mrb[23].mxu0  ;;  %v1112_v21 = vpop.f32.mrb[23].mxu1  ;;  %v4312_v13 = vld [vmem:[#allocation10] ss:$16 sps:$4 sm:$0xff]  }
 0x268   :  { %v3213_v33 = vmul.f32 -1.442695, %v1115_v15  ;;  %v3214_v34 = vmul.f32 -1.442695, %v1117_v17  ;;  %v4324_v15 = vld [vmem:[#allocation10 + $0x20] ss:$16 sps:$4 sm:$0xff]  }
 0x269   :  { %3601 = vpow2.f32 %v3212_v20  ;;  %v4326_v17 = vld [vmem:[#allocation10 + $0x28] ss:$16 sps:$4 sm:$0xff]   ;;  %v4332_v19 = vld [vmem:[#allocation10 + $0x44] ss:$16 sps:$4 sm:$0xff]   ;;  %v4334_v18 = vld [vmem:[#allocation10 + $0x4c] ss:$16 sps:$4 sm:$0xff]  }
 0x26a   :  { %3603 = vpow2.f32 %v3213_v33  ;;  %v4336_v20 = vld [vmem:[#allocation10 + $0x40] ss:$16 sps:$4 sm:$0xff]   ;;  %v4338_v0 = vld [vmem:[#allocation10 + $0x48] ss:$16 sps:$4 sm:$0xff]   ;;  %v4344_v21 = vld [vmem:[#allocation10 + $0x64] ss:$16 sps:$4 sm:$0xff]  }
 0x26b   :  { %3605 = vpow2.f32 %v3214_v34  ;;  %v4346_v33 = vld [vmem:[#allocation10 + $0x6c] ss:$16 sps:$4 sm:$0xff]   ;;  %v4348_v34 = vld [vmem:[#allocation10 + $0x60] ss:$16 sps:$4 sm:$0xff]  }
 0x26c   :  { %3607 = vtanh.f32 %v1116_v24  ;;  %v4314_v24 = vld [vmem:[#allocation10 + $0x8] ss:$16 sps:$4 sm:$0xff]  }
 0x273   :  { %v3602_v22 = vpop.eup %3601 }
 0x274   :  { %v3604_v10 = vpop.eup %3603  ;;  %v1121_v25 = vadd.f32 1.0, %v3602_v22  ;;  %v4350_v22 = vld [vmem:[#allocation10 + $0x68] ss:$16 sps:$4 sm:$0xff]  }
 0x275   :  { %v1127_v27 = vadd.f32 1.0, %v3604_v10  ;;  %v3606_v29 = vpop.eup %3605  ;;  %v4356_v10 = vld [vmem:[#allocation10 + $0x80] ss:$16 sps:$4 sm:$0xff]  }
 0x276   :  { %3609 = vrcp.f32 %v1121_v25  ;;  %v3608_v8 = vpop.eup %3607  ;;  %v1134_v62 = vadd.f32 1.0, %v3606_v29  ;;  %v4358_v25 = vld [vmem:[#allocation10 + $0x84] ss:$16 sps:$4 sm:$0xff]   ;;  %v4362_v29 = vld [vmem:[#allocation10 + $0x8c] ss:$16 sps:$4 sm:$0xff]  }
 0x277   :  { %3611 = vrcp.f32 %v1127_v27  ;;  %v4360_v27 = vld [vmem:[#allocation10 + $0x88] ss:$16 sps:$4 sm:$0xff]  }
 0x278   :  { %3613 = vrcp.f32 %v1134_v62  ;;  %v4377_v62 = vld [vmem:[#allocation10 + $0xc4] ss:$16 sps:$4 sm:$0xff]  }
 0x280   :  { %v3610_v30 = vpop.eup %3609 }
 0x281   :  { %v3612_v12 = vpop.eup %3611  ;;  %v1138_v28 = vmul.f32 %v3610_v30, %v3608_v8  ;;  %v4364_v8 = vld [vmem:[#allocation10 + $0xa4] ss:$16 sps:$4 sm:$0xff]   ;;  %v4367_v30 = vld [vmem:[#allocation10 + $0xac] ss:$16 sps:$4 sm:$0xff]  }
 0x282   :  { %v1137_v23 = vmul.f32 %v3612_v12, %v4221_v26  ;;  %v3614_v11 = vpop.eup %3613  ;;  %v4310_v26 = vld [vmem:[#allocation10 + $0xc] ss:$16 sps:$4 sm:$0xff]   ;;  %v4371_v12 = vld [vmem:[#allocation10 + $0xa0] ss:$16 sps:$4 sm:$0xff]  }
 0x284   :  { %v4263_v44 = vadd.f32 %v1138_v28, %v1137_v23  ;;  %v4375_v28 = vld [vmem:[#allocation10 + $0xa8] ss:$16 sps:$4 sm:$0xff]   ;;  %v4380_v23 = vld [vmem:[#allocation10 + $0xcc] ss:$16 sps:$4 sm:$0xff]  }
 0x286   :  { %3615 = vtanh.f32 %v4263_v44 }
 0x290   :  { %v3616_v31 = vpop.eup %3615 }
 0x291   :  { %v1141_v7 = vmul.f32 %v3616_v31, %v3614_v11  ;;  %v4387_v11 = vld [vmem:[#allocation10 + $0xc8] ss:$16 sps:$4 sm:$0xff]   ;;  %v4389_v31 = vld [vmem:[#allocation10 + $0xe4] ss:$16 sps:$4 sm:$0xff]  }
 0x293   :  { %v1144_v9 = vpack.c.bf16 %v1141_v7, %v1141_v7  ;;  %v4392_v7 = vld [vmem:[#allocation10 + $0xec] ss:$16 sps:$4 sm:$0xff]  }
 0x295   :  { %1146 = vst [vmem:[#allocation13 + $0x4] sm:$0xf] %v1144_v9  ;;  %1382 = vmatmul.mubr.bf16.vlgmr.msra.gmra.mrb[24].mxu0 %v1144_v9  ;;  %1423 = vmatmul.mubr.bf16.vlgmr.msra.gmra.mrb[24].mxu1 %v1144_v9  ;;  %v4395_v9 = vld [vmem:[#allocation10 + $0xe0] ss:$16 sps:$4 sm:$0xff]  }
 0x296   :  { %1667 = vmatpush1.bf16.msra.mxu0 %v3997_v36  ;;  %1708 = vmatpush1.bf16.msra.mxu1 %v3999_v37 }
 0x297   :  { %1668 = vmatprep.subr.bf16.mxu0 %v4003_v38  ;;  %1709 = vmatprep.subr.bf16.mxu1 %v4005_v39 }
 0x298   :  { %1698 = vmatprep.mubr.bf16.mxu0 %v4624_v14  ;;  %1739 = vmatprep.mubr.bf16.mxu1 %v4624_v14 }
 0x29a   :  { %1669 = vmatpush1.bf16.msra.mxu0 %v4007_v40  ;;  %1710 = vmatpush1.bf16.msra.mxu1 %v4011_v41 }
 0x29b   :  { %1670 = vmatprep.subr.bf16.mxu0 %v4015_v42  ;;  %1711 = vmatprep.subr.bf16.mxu1 %v4017_v43  ;;  %v4625_v43 = vld [vmem:[#allocation22_spill] sm:$0xff] }
 0x29e   :  { %1671 = vmatpush1.bf16.msra.mxu0 %v4021_v45  ;;  %1712 = vmatpush1.bf16.msra.mxu1 %v4023_v46 }
 0x29f   :  { %1672 = vmatprep.subr.bf16.mxu0 %v4027_v47  ;;  %1713 = vmatprep.subr.bf16.mxu1 %v4031_v48 }
 0x2a2   :  { %1673 = vmatpush1.bf16.msra.mxu0 %v4033_v49  ;;  %1714 = vmatpush1.bf16.msra.mxu1 %v4035_v50 }
 0x2a3   :  { %1674 = vmatprep.subr.bf16.mxu0 %v4039_v51  ;;  %1715 = vmatprep.subr.bf16.mxu1 %v4043_v52 }
 0x2a6   :  { %1675 = vmatpush1.bf16.msra.mxu0 %v4047_v54  ;;  %1716 = vmatpush1.bf16.msra.mxu1 %v4049_v55 }
 0x2a7   :  { %1676 = vmatprep.subr.bf16.mxu0 %v4051_v56  ;;  %1717 = vmatprep.subr.bf16.mxu1 %v4053_v57 }
 0x2aa   :  { %1677 = vmatpush1.bf16.msra.mxu0 %v4059_v58  ;;  %1718 = vmatpush1.bf16.msra.mxu1 %v4061_v59 }
 0x2ab   :  { %1678 = vmatprep.subr.bf16.mxu0 %v4063_v60  ;;  %1719 = vmatprep.subr.bf16.mxu1 %v4065_v61 }
 0x2ae   :  { %1679 = vmatpush1.bf16.msra.mxu0 %v4073_v63  ;;  %1720 = vmatpush1.bf16.msra.mxu1 %v4075_v1 }
 0x2af   :  { %1680 = vmatprep.subr.bf16.mxu0 %v4077_v2  ;;  %1721 = vmatprep.subr.bf16.mxu1 %v4079_v3 }
 0x2b2   :  { %1681 = vmatpush1.bf16.msra.mxu0 %v4087_v4  ;;  %1722 = vmatpush1.bf16.msra.mxu1 %v4089_v5 }
 0x2b3   :  { %2024 = vmatprep.subr.bf16.mxu1 %v4310_v26 }
 0x368   :  { %v1383_v36 = vpop.f32.mrb[24].mxu0  ;;  %v1424_v37 = vpop.f32.mrb[24].mxu1 }
 0x369   :  { %v1431_v38 = vadd.f32 %v1383_v36, %v4154_v35  ;;  %v1433_v39 = vadd.f32 %v1424_v37, %v4157_v53  ;;  %v1385_v40 = vpop.f32.mrb[25].mxu0  ;;  %v1426_v41 = vpop.f32.mrb[25].mxu1  ;;  %v4399_v36 = vld [vmem:[#allocation10 + $0xe8] ss:$16 sps:$4 sm:$0xff]  }
 0x36a   :  { %v1432_v42 = vadd.f32 %v1385_v40, %v4159_v6  ;;  %v1434_v45 = vadd.f32 %v1426_v41, %v4625_v43  ;;  %v1387_v46 = vpop.f32.mrb[26].mxu0  ;;  %v1428_v47 = vpop.f32.mrb[26].mxu1  ;;  %v4308_v6 = vld [vmem:[#allocation10 + $0x4] ss:$16 sps:$4 sm:$0xff]  }
 0x36b   :  { %v3247_v48 = vmul.f32 -1.442695, %v1431_v38  ;;  %v1388_v49 = vpop.f32.mrb[27].mxu0  ;;  %v1429_v50 = vpop.f32.mrb[27].mxu1  ;;  %1983 = vmatprep.subr.bf16.mxu0 %v4308_v6  ;;  %v4627_v41 = vld [vmem:[#allocation24_spill] sm:$0xff]  ;;  %v4628_v46 = vld [vmem:[#allocation25_spill] sm:$0xff] }
 0x36c   :  { %v3248_v51 = vmul.f32 -1.442695, %v1432_v42  ;;  %v3249_v52 = vmul.f32 -1.442695, %v1434_v45 }
 0x36d   :  { %3617 = vpow2.f32 %v3247_v48  ;;  %v4629_v48 = vld [vmem:[#allocation26_spill] sm:$0xff] }
 0x36e   :  { %3619 = vpow2.f32 %v3248_v51 }
 0x36f   :  { %3621 = vpow2.f32 %v3249_v52 }
 0x370   :  { %3623 = vtanh.f32 %v1433_v39  ;;  %v4626_v39 = vld [vmem:[#allocation23_spill] sm:$0xff] }
 0x377   :  { %v3618_v54 = vpop.eup %3617 }
 0x378   :  { %v3620_v55 = vpop.eup %3619  ;;  %v1438_v56 = vadd.f32 1.0, %v3618_v54 }
 0x379   :  { %v1444_v57 = vadd.f32 1.0, %v3620_v55  ;;  %v3622_v58 = vpop.eup %3621 }
 0x37a   :  { %3625 = vrcp.f32 %v1438_v56  ;;  %v3624_v59 = vpop.eup %3623  ;;  %v1451_v1 = vadd.f32 1.0, %v3622_v58 }
 0x37b   :  { %3627 = vrcp.f32 %v1444_v57 }
 0x37c   :  { %3629 = vrcp.f32 %v1451_v1 }
 0x384   :  { %v3626_v60 = vpop.eup %3625 }
 0x385   :  { %v3628_v61 = vpop.eup %3627  ;;  %v1455_v63 = vmul.f32 %v3626_v60, %v3624_v59 }
 0x386   :  { %v1454_v2 = vmul.f32 %v3628_v61, %v4263_v44  ;;  %v3630_v4 = vpop.eup %3629  ;;  %v4383_v44 = vld [vmem:[#allocation10 + $0xc0] ss:$16 sps:$4 sm:$0xff]  }
 0x388   :  { %v4303_v3 = vadd.f32 %v1455_v63, %v1454_v2 }
 0x38a   :  { %3631 = vtanh.f32 %v4303_v3 }
 0x394   :  { %v3632_v5 = vpop.eup %3631 }
 0x395   :  { %v1458_v35 = vmul.f32 %v3632_v5, %v3630_v4 }
 0x397   :  { %v1461_v53 = vpack.c.bf16 %v1458_v35, %v1458_v35 }
 0x399   :  { %1463 = vst [vmem:[#allocation13 + $0x8] sm:$0xf] %v1461_v53  ;;  %1699 = vmatmul.mubr.bf16.vlgmr.msra.gmra.mrb[28].mxu0 %v1461_v53  ;;  %1740 = vmatmul.mubr.bf16.vlgmr.msra.gmra.mrb[28].mxu1 %v1461_v53 }
 0x39a   :  { %2015 = vmatprep.mubr.bf16.mxu0 %v4624_v14  ;;  %2056 = vmatprep.mubr.bf16.mxu1 %v4624_v14 }
 0x39b   :  { %1984 = vmatpush1.bf16.msra.mxu0 %v4312_v13  ;;  %2025 = vmatpush1.bf16.msra.mxu1 %v4314_v24 }
 0x39c   :  { %1985 = vmatprep.subr.bf16.mxu0 %v4320_v32  ;;  %2026 = vmatprep.subr.bf16.mxu1 %v4322_v16 }
 0x39f   :  { %1986 = vmatpush1.bf16.msra.mxu0 %v4324_v15  ;;  %2027 = vmatpush1.bf16.msra.mxu1 %v4326_v17 }
 0x3a0   :  { %1987 = vmatprep.subr.bf16.mxu0 %v4332_v19  ;;  %2028 = vmatprep.subr.bf16.mxu1 %v4334_v18 }
 0x3a3   :  { %1988 = vmatpush1.bf16.msra.mxu0 %v4336_v20  ;;  %2029 = vmatpush1.bf16.msra.mxu1 %v4338_v0 }
 0x3a4   :  { %1989 = vmatprep.subr.bf16.mxu0 %v4344_v21  ;;  %2030 = vmatprep.subr.bf16.mxu1 %v4346_v33 }
 0x3a7   :  { %1990 = vmatpush1.bf16.msra.mxu0 %v4348_v34  ;;  %2031 = vmatpush1.bf16.msra.mxu1 %v4350_v22 }
 0x3a8   :  { %1991 = vmatprep.subr.bf16.mxu0 %v4358_v25  ;;  %2032 = vmatprep.subr.bf16.mxu1 %v4362_v29 }
 0x3ab   :  { %1992 = vmatpush1.bf16.msra.mxu0 %v4356_v10  ;;  %2033 = vmatpush1.bf16.msra.mxu1 %v4360_v27 }
 0x3ac   :  { %1993 = vmatprep.subr.bf16.mxu0 %v4364_v8  ;;  %2034 = vmatprep.subr.bf16.mxu1 %v4367_v30 }
 0x3af   :  { %1994 = vmatpush1.bf16.msra.mxu0 %v4371_v12  ;;  %2035 = vmatpush1.bf16.msra.mxu1 %v4375_v28 }
 0x3b0   :  { %1995 = vmatprep.subr.bf16.mxu0 %v4377_v62  ;;  %2036 = vmatprep.subr.bf16.mxu1 %v4380_v23 }
 0x3b3   :  { %1996 = vmatpush1.bf16.msra.mxu0 %v4383_v44  ;;  %2037 = vmatpush1.bf16.msra.mxu1 %v4387_v11 }
 0x3b4   :  { %1997 = vmatprep.subr.bf16.mxu0 %v4389_v31  ;;  %2038 = vmatprep.subr.bf16.mxu1 %v4392_v7 }
 0x3b7   :  { %1998 = vmatpush1.bf16.msra.mxu0 %v4395_v9  ;;  %2039 = vmatpush1.bf16.msra.mxu1 %v4399_v36 }
 0x3b8   :  { %2300 = vmatprep.subr.bf16.mxu0 %v4308_v6  ;;  %2341 = vmatprep.subr.bf16.mxu1 %v4310_v26 }
 0x46c   :  { %v1700_v37 = vpop.f32.mrb[28].mxu0  ;;  %v1741_v38 = vpop.f32.mrb[28].mxu1 }
 0x46d   :  { %v1748_v40 = vadd.f32 %v1700_v37, %v4626_v39  ;;  %v1750_v42 = vadd.f32 %v1741_v38, %v4627_v41  ;;  %v1702_v43 = vpop.f32.mrb[29].mxu0  ;;  %v1743_v45 = vpop.f32.mrb[29].mxu1 }
 0x46e   :  { %v1749_v47 = vadd.f32 %v1702_v43, %v4628_v46  ;;  %v1751_v49 = vadd.f32 %v1743_v45, %v4629_v48  ;;  %v1704_v50 = vpop.f32.mrb[30].mxu0  ;;  %v1745_v51 = vpop.f32.mrb[30].mxu1  ;;  %v4630_v43 = vld [vmem:[#allocation27_spill] sm:$0xff]  ;;  %v4631_v46 = vld [vmem:[#allocation28_spill] sm:$0xff] }
 0x46f   :  { %v3282_v52 = vmul.f32 -1.442695, %v1748_v40  ;;  %v1705_v54 = vpop.f32.mrb[31].mxu0  ;;  %v1746_v55 = vpop.f32.mrb[31].mxu1  ;;  %v4632_v50 = vld [vmem:[#allocation29_spill] sm:$0xff] }
 0x470   :  { %v3283_v56 = vmul.f32 -1.442695, %v1749_v47  ;;  %v3284_v57 = vmul.f32 -1.442695, %v1751_v49 }
 0x471   :  { %3633 = vpow2.f32 %v3282_v52  ;;  %v4633_v52 = vld [vmem:[#allocation30_spill] sm:$0xff] }
 0x472   :  { %3635 = vpow2.f32 %v3283_v56 }
 0x473   :  { %3637 = vpow2.f32 %v3284_v57 }
 0x474   :  { %3639 = vtanh.f32 %v1750_v42 }
 0x47b   :  { %v3634_v58 = vpop.eup %3633 }
 0x47c   :  { %v3636_v59 = vpop.eup %3635  ;;  %v1755_v60 = vadd.f32 1.0, %v3634_v58 }
 0x47d   :  { %v1761_v61 = vadd.f32 1.0, %v3636_v59  ;;  %v3638_v63 = vpop.eup %3637 }
 0x47e   :  { %3641 = vrcp.f32 %v1755_v60  ;;  %v3640_v1 = vpop.eup %3639  ;;  %v1768_v35 = vadd.f32 1.0, %v3638_v63 }
 0x47f   :  { %3643 = vrcp.f32 %v1761_v61 }
 0x480   :  { %3645 = vrcp.f32 %v1768_v35 }
 0x488   :  { %v3642_v2 = vpop.eup %3641 }
 0x489   :  { %v3644_v4 = vpop.eup %3643  ;;  %v1772_v5 = vmul.f32 %v3642_v2, %v3640_v1 }
 0x48a   :  { %v1771_v53 = vmul.f32 %v3644_v4, %v4303_v3  ;;  %v3646_v38 = vpop.eup %3645 }
 0x48c   :  { %v4411_v37 = vadd.f32 %v1772_v5, %v1771_v53 }
 0x48e   :  { %3647 = vtanh.f32 %v4411_v37 }
 0x498   :  { %v3648_v39 = vpop.eup %3647 }
 0x499   :  { %v1775_v40 = vmul.f32 %v3648_v39, %v3646_v38 }
 0x49b   :  { %v1778_v41 = vpack.c.bf16 %v1775_v40, %v1775_v40 }
 0x49d   :  { %1780 = vst [vmem:[#allocation13 + $0xc] sm:$0xf] %v1778_v41  ;;  %2016 = vmatmul.mubr.bf16.vlgmr.msra.gmra.mrb[32].mxu0 %v1778_v41  ;;  %2057 = vmatmul.mubr.bf16.vlgmr.msra.gmra.mrb[32].mxu1 %v1778_v41 }
 0x49e   :  { %2301 = vmatpush1.bf16.msra.mxu0 %v4312_v13  ;;  %2342 = vmatpush1.bf16.msra.mxu1 %v4314_v24 }
 0x49f   :  { %2302 = vmatprep.subr.bf16.mxu0 %v4320_v32  ;;  %2343 = vmatprep.subr.bf16.mxu1 %v4322_v16 }
 0x4a0   :  { %2332 = vmatprep.mubr.bf16.mxu0 %v4624_v14  ;;  %2373 = vmatprep.mubr.bf16.mxu1 %v4624_v14 }
 0x4a2   :  { %2303 = vmatpush1.bf16.msra.mxu0 %v4324_v15  ;;  %2344 = vmatpush1.bf16.msra.mxu1 %v4326_v17 }
 0x4a3   :  { %2304 = vmatprep.subr.bf16.mxu0 %v4332_v19  ;;  %2345 = vmatprep.subr.bf16.mxu1 %v4334_v18 }
 0x4a6   :  { %2305 = vmatpush1.bf16.msra.mxu0 %v4336_v20  ;;  %2346 = vmatpush1.bf16.msra.mxu1 %v4338_v0 }
 0x4a7   :  { %2306 = vmatprep.subr.bf16.mxu0 %v4344_v21  ;;  %2347 = vmatprep.subr.bf16.mxu1 %v4346_v33 }
 0x4aa   :  { %2307 = vmatpush1.bf16.msra.mxu0 %v4348_v34  ;;  %2348 = vmatpush1.bf16.msra.mxu1 %v4350_v22 }
 0x4ab   :  { %2308 = vmatprep.subr.bf16.mxu0 %v4358_v25  ;;  %2349 = vmatprep.subr.bf16.mxu1 %v4362_v29 }
 0x4ae   :  { %2309 = vmatpush1.bf16.msra.mxu0 %v4356_v10  ;;  %2350 = vmatpush1.bf16.msra.mxu1 %v4360_v27 }
 0x4af   :  { %2310 = vmatprep.subr.bf16.mxu0 %v4364_v8  ;;  %2351 = vmatprep.subr.bf16.mxu1 %v4367_v30 }
 0x4b2   :  { %2311 = vmatpush1.bf16.msra.mxu0 %v4371_v12  ;;  %2352 = vmatpush1.bf16.msra.mxu1 %v4375_v28 }
 0x4b3   :  { %2312 = vmatprep.subr.bf16.mxu0 %v4377_v62  ;;  %2353 = vmatprep.subr.bf16.mxu1 %v4380_v23 }
 0x4b6   :  { %2313 = vmatpush1.bf16.msra.mxu0 %v4383_v44  ;;  %2354 = vmatpush1.bf16.msra.mxu1 %v4387_v11 }
 0x4b7   :  { %2314 = vmatprep.subr.bf16.mxu0 %v4389_v31  ;;  %2355 = vmatprep.subr.bf16.mxu1 %v4392_v7 }
 0x4ba   :  { %2315 = vmatpush1.bf16.msra.mxu0 %v4395_v9  ;;  %2356 = vmatpush1.bf16.msra.mxu1 %v4399_v36 }
 0x4bb   :  { %2617 = vmatprep.subr.bf16.mxu0 %v4308_v6  ;;  %2658 = vmatprep.subr.bf16.mxu1 %v4310_v26 }
 0x570   :  { %v2017_v3 = vpop.f32.mrb[32].mxu0  ;;  %v2058_v42 = vpop.f32.mrb[32].mxu1 }
 0x571   :  { %v2065_v45 = vadd.f32 %v2017_v3, %v4630_v43  ;;  %v2067_v47 = vadd.f32 %v2058_v42, %v4631_v46  ;;  %v2019_v48 = vpop.f32.mrb[33].mxu0  ;;  %v2060_v49 = vpop.f32.mrb[33].mxu1 }
 0x572   :  { %v2066_v51 = vadd.f32 %v2019_v48, %v4632_v50  ;;  %v2068_v54 = vadd.f32 %v2060_v49, %v4633_v52  ;;  %v2021_v55 = vpop.f32.mrb[34].mxu0  ;;  %v2062_v56 = vpop.f32.mrb[34].mxu1  ;;  %v4634_v48 = vld [vmem:[#allocation31_spill] sm:$0xff]  ;;  %v4635_v50 = vld [vmem:[#allocation32_spill] sm:$0xff] }
 0x573   :  { %v3317_v57 = vmul.f32 -1.442695, %v2065_v45  ;;  %v2022_v58 = vpop.f32.mrb[35].mxu0  ;;  %v2063_v59 = vpop.f32.mrb[35].mxu1  ;;  %v4636_v55 = vld [vmem:[#allocation33_spill] sm:$0xff] }
 0x574   :  { %v3318_v60 = vmul.f32 -1.442695, %v2066_v51  ;;  %v3319_v61 = vmul.f32 -1.442695, %v2068_v54 }
 0x575   :  { %3649 = vpow2.f32 %v3317_v57  ;;  %v4637_v57 = vld [vmem:[#allocation34_spill] sm:$0xff] }
 0x576   :  { %3651 = vpow2.f32 %v3318_v60 }
 0x577   :  { %3653 = vpow2.f32 %v3319_v61 }
 0x578   :  { %3655 = vtanh.f32 %v2067_v47 }
 0x57f   :  { %v3650_v63 = vpop.eup %3649 }
 0x580   :  { %v3652_v1 = vpop.eup %3651  ;;  %v2072_v2 = vadd.f32 1.0, %v3650_v63 }
 0x581   :  { %v2078_v4 = vadd.f32 1.0, %v3652_v1  ;;  %v3654_v5 = vpop.eup %3653 }
 0x582   :  { %3657 = vrcp.f32 %v2072_v2  ;;  %v3656_v35 = vpop.eup %3655  ;;  %v2085_v40 = vadd.f32 1.0, %v3654_v5 }
 0x583   :  { %3659 = vrcp.f32 %v2078_v4 }
 0x584   :  { %3661 = vrcp.f32 %v2085_v40 }
 0x58c   :  { %v3658_v53 = vpop.eup %3657 }
 0x58d   :  { %v3660_v38 = vpop.eup %3659  ;;  %v2089_v39 = vmul.f32 %v3658_v53, %v3656_v35 }
 0x58e   :  { %v2088_v41 = vmul.f32 %v3660_v38, %v4411_v37  ;;  %v3662_v42 = vpop.eup %3661 }
 0x590   :  { %v4453_v3 = vadd.f32 %v2089_v39, %v2088_v41 }
 0x592   :  { %3663 = vtanh.f32 %v4453_v3 }
 0x59c   :  { %v3664_v43 = vpop.eup %3663 }
 0x59d   :  { %v2092_v45 = vmul.f32 %v3664_v43, %v3662_v42 }
 0x59f   :  { %v2095_v46 = vpack.c.bf16 %v2092_v45, %v2092_v45 }
 0x5a1   :  { %2097 = vst [vmem:[#allocation13 + $0x10] sm:$0xf] %v2095_v46  ;;  %2333 = vmatmul.mubr.bf16.vlgmr.msra.gmra.mrb[36].mxu0 %v2095_v46  ;;  %2374 = vmatmul.mubr.bf16.vlgmr.msra.gmra.mrb[36].mxu1 %v2095_v46 }
 0x5a2   :  { %2618 = vmatpush1.bf16.msra.mxu0 %v4312_v13  ;;  %2659 = vmatpush1.bf16.msra.mxu1 %v4314_v24 }
 0x5a3   :  { %2619 = vmatprep.subr.bf16.mxu0 %v4320_v32  ;;  %2660 = vmatprep.subr.bf16.mxu1 %v4322_v16 }
 0x5a4   :  { %2649 = vmatprep.mubr.bf16.mxu0 %v4624_v14  ;;  %2690 = vmatprep.mubr.bf16.mxu1 %v4624_v14 }
 0x5a6   :  { %2620 = vmatpush1.bf16.msra.mxu0 %v4324_v15  ;;  %2661 = vmatpush1.bf16.msra.mxu1 %v4326_v17 }
 0x5a7   :  { %2621 = vmatprep.subr.bf16.mxu0 %v4332_v19  ;;  %2662 = vmatprep.subr.bf16.mxu1 %v4334_v18 }
 0x5aa   :  { %2622 = vmatpush1.bf16.msra.mxu0 %v4336_v20  ;;  %2663 = vmatpush1.bf16.msra.mxu1 %v4338_v0 }
 0x5ab   :  { %2623 = vmatprep.subr.bf16.mxu0 %v4344_v21  ;;  %2664 = vmatprep.subr.bf16.mxu1 %v4346_v33 }
 0x5ae   :  { %2624 = vmatpush1.bf16.msra.mxu0 %v4348_v34  ;;  %2665 = vmatpush1.bf16.msra.mxu1 %v4350_v22 }
 0x5af   :  { %2625 = vmatprep.subr.bf16.mxu0 %v4358_v25  ;;  %2666 = vmatprep.subr.bf16.mxu1 %v4362_v29 }
 0x5b2   :  { %2626 = vmatpush1.bf16.msra.mxu0 %v4356_v10  ;;  %2667 = vmatpush1.bf16.msra.mxu1 %v4360_v27 }
 0x5b3   :  { %2627 = vmatprep.subr.bf16.mxu0 %v4364_v8  ;;  %2668 = vmatprep.subr.bf16.mxu1 %v4367_v30 }
 0x5b6   :  { %2628 = vmatpush1.bf16.msra.mxu0 %v4371_v12  ;;  %2669 = vmatpush1.bf16.msra.mxu1 %v4375_v28 }
 0x5b7   :  { %2629 = vmatprep.subr.bf16.mxu0 %v4377_v62  ;;  %2670 = vmatprep.subr.bf16.mxu1 %v4380_v23 }
 0x5ba   :  { %2630 = vmatpush1.bf16.msra.mxu0 %v4383_v44  ;;  %2671 = vmatpush1.bf16.msra.mxu1 %v4387_v11 }
 0x5bb   :  { %2631 = vmatprep.subr.bf16.mxu0 %v4389_v31  ;;  %2672 = vmatprep.subr.bf16.mxu1 %v4392_v7 }
 0x5be   :  { %2632 = vmatpush1.bf16.msra.mxu0 %v4395_v9  ;;  %2673 = vmatpush1.bf16.msra.mxu1 %v4399_v36 }
 0x5bf   :  { %2934 = vmatprep.subr.bf16.mxu0 %v4308_v6  ;;  %2975 = vmatprep.subr.bf16.mxu1 %v4310_v26 }
 0x674   :  { %v2334_v37 = vpop.f32.mrb[36].mxu0  ;;  %v2375_v47 = vpop.f32.mrb[36].mxu1 }
 0x675   :  { %v2382_v49 = vadd.f32 %v2334_v37, %v4634_v48  ;;  %v2384_v51 = vadd.f32 %v2375_v47, %v4635_v50  ;;  %v2336_v52 = vpop.f32.mrb[37].mxu0  ;;  %v2377_v54 = vpop.f32.mrb[37].mxu1 }
 0x676   :  { %v2383_v56 = vadd.f32 %v2336_v52, %v4636_v55  ;;  %v2385_v58 = vadd.f32 %v2377_v54, %v4637_v57  ;;  %v2338_v59 = vpop.f32.mrb[38].mxu0  ;;  %v2379_v60 = vpop.f32.mrb[38].mxu1  ;;  %v4642_v55 = vld [vmem:[#allocation39_spill] sm:$0xff]  ;;  %v4643_v57 = vld [vmem:[#allocation40_spill] sm:$0xff] }
 0x677   :  { %v3352_v61 = vmul.f32 -1.442695, %v2382_v49  ;;  %v2339_v63 = vpop.f32.mrb[39].mxu0  ;;  %v2380_v1 = vpop.f32.mrb[39].mxu1 }
 0x678   :  { %v3353_v6 = vmul.f32 -1.442695, %v2383_v56  ;;  %v3354_v26 = vmul.f32 -1.442695, %v2385_v58  ;;  %v4645_v1 = vld [vmem:[#allocation42_spill] sm:$0xff] }
 0x679   :  { %3665 = vpow2.f32 %v3352_v61  ;;  %v4644_v61 = vld [vmem:[#allocation41_spill] sm:$0xff] }
 0x67a   :  { %3667 = vpow2.f32 %v3353_v6 }
 0x67b   :  { %3669 = vpow2.f32 %v3354_v26 }
 0x67c   :  { %3671 = vtanh.f32 %v2384_v51 }
 0x683   :  { %v3666_v2 = vpop.eup %3665 }
 0x684   :  { %v3668_v4 = vpop.eup %3667  ;;  %v2389_v5 = vadd.f32 1.0, %v3666_v2 }
 0x685   :  { %v2395_v35 = vadd.f32 1.0, %v3668_v4  ;;  %v3670_v53 = vpop.eup %3669 }
 0x686   :  { %3673 = vrcp.f32 %v2389_v5  ;;  %v3672_v38 = vpop.eup %3671  ;;  %v2402_v42 = vadd.f32 1.0, %v3670_v53 }
 0x687   :  { %3675 = vrcp.f32 %v2395_v35 }
 0x688   :  { %3677 = vrcp.f32 %v2402_v42 }
 0x690   :  { %v3674_v39 = vpop.eup %3673 }
 0x691   :  { %v3676_v40 = vpop.eup %3675  ;;  %v2406_v41 = vmul.f32 %v3674_v39, %v3672_v38 }
 0x692   :  { %v2405_v43 = vmul.f32 %v3676_v40, %v4453_v3  ;;  %v3678_v46 = vpop.eup %3677 }
 0x694   :  { %v4495_v45 = vadd.f32 %v2406_v41, %v2405_v43 }
 0x696   :  { %3679 = vtanh.f32 %v4495_v45 }
 0x6a0   :  { %v3680_v37 = vpop.eup %3679 }
 0x6a1   :  { %v2409_v47 = vmul.f32 %v3680_v37, %v3678_v46 }
 0x6a3   :  { %v2412_v48 = vpack.c.bf16 %v2409_v47, %v2409_v47 }
 0x6a5   :  { %2414 = vst [vmem:[#allocation13 + $0x14] sm:$0xf] %v2412_v48  ;;  %2650 = vmatmul.mubr.bf16.vlgmr.msra.gmra.mrb[40].mxu0 %v2412_v48  ;;  %2691 = vmatmul.mubr.bf16.vlgmr.msra.gmra.mrb[40].mxu1 %v2412_v48 }
 0x6a6   :  { %2935 = vmatpush1.bf16.msra.mxu0 %v4312_v13  ;;  %2976 = vmatpush1.bf16.msra.mxu1 %v4314_v24  ;;  %v4638_v24 = vld [vmem:[#allocation35_spill] sm:$0xff] }
 0x6a7   :  { %2936 = vmatprep.subr.bf16.mxu0 %v4320_v32  ;;  %2977 = vmatprep.subr.bf16.mxu1 %v4322_v16  ;;  %v4639_v16 = vld [vmem:[#allocation36_spill] sm:$0xff] }
 0x6a8   :  { %2966 = vmatprep.mubr.bf16.mxu0 %v4624_v14  ;;  %3007 = vmatprep.mubr.bf16.mxu1 %v4624_v14 }
 0x6aa   :  { %2937 = vmatpush1.bf16.msra.mxu0 %v4324_v15  ;;  %2978 = vmatpush1.bf16.msra.mxu1 %v4326_v17 }
 0x6ab   :  { %2938 = vmatprep.subr.bf16.mxu0 %v4332_v19  ;;  %2979 = vmatprep.subr.bf16.mxu1 %v4334_v18  ;;  %v4640_v18 = vld [vmem:[#allocation37_spill] sm:$0xff] }
 0x6ae   :  { %2939 = vmatpush1.bf16.msra.mxu0 %v4336_v20  ;;  %2980 = vmatpush1.bf16.msra.mxu1 %v4338_v0  ;;  %v4641_v0 = vld [vmem:[#allocation38_spill] sm:$0xff] }
 0x6af   :  { %2940 = vmatprep.subr.bf16.mxu0 %v4344_v21  ;;  %2981 = vmatprep.subr.bf16.mxu1 %v4346_v33 }
 0x6b2   :  { %2941 = vmatpush1.bf16.msra.mxu0 %v4348_v34  ;;  %2982 = vmatpush1.bf16.msra.mxu1 %v4350_v22 }
 0x6b3   :  { %2942 = vmatprep.subr.bf16.mxu0 %v4358_v25  ;;  %2983 = vmatprep.subr.bf16.mxu1 %v4362_v29 }
 0x6b6   :  { %2943 = vmatpush1.bf16.msra.mxu0 %v4356_v10  ;;  %2984 = vmatpush1.bf16.msra.mxu1 %v4360_v27 }
 0x6b7   :  { %2944 = vmatprep.subr.bf16.mxu0 %v4364_v8  ;;  %2985 = vmatprep.subr.bf16.mxu1 %v4367_v30 }
 0x6ba   :  { %2945 = vmatpush1.bf16.msra.mxu0 %v4371_v12  ;;  %2986 = vmatpush1.bf16.msra.mxu1 %v4375_v28 }
 0x6bb   :  { %2946 = vmatprep.subr.bf16.mxu0 %v4377_v62  ;;  %2987 = vmatprep.subr.bf16.mxu1 %v4380_v23 }
 0x6be   :  { %2947 = vmatpush1.bf16.msra.mxu0 %v4383_v44  ;;  %2988 = vmatpush1.bf16.msra.mxu1 %v4387_v11 }
 0x6bf   :  { %2948 = vmatprep.subr.bf16.mxu0 %v4389_v31  ;;  %2989 = vmatprep.subr.bf16.mxu1 %v4392_v7 }
 0x6c2   :  { %2949 = vmatpush1.bf16.msra.mxu0 %v4395_v9  ;;  %2990 = vmatpush1.bf16.msra.mxu1 %v4399_v36 }
 0x778   :  { %v2651_v14 = vpop.f32.mrb[40].mxu0  ;;  %v2692_v13 = vpop.f32.mrb[40].mxu1 }
 0x779   :  { %v2699_v32 = vadd.f32 %v2651_v14, %v4638_v24  ;;  %v2701_v15 = vadd.f32 %v2692_v13, %v4639_v16  ;;  %v2653_v17 = vpop.f32.mrb[41].mxu0  ;;  %v2694_v19 = vpop.f32.mrb[41].mxu1 }
 0x77a   :  { %v2700_v20 = vadd.f32 %v2653_v17, %v4640_v18  ;;  %v2702_v21 = vadd.f32 %v2694_v19, %v4641_v0  ;;  %v2655_v33 = vpop.f32.mrb[42].mxu0  ;;  %v2696_v34 = vpop.f32.mrb[42].mxu1 }
 0x77b   :  { %v3387_v22 = vmul.f32 -1.442695, %v2699_v32  ;;  %v2656_v10 = vpop.f32.mrb[43].mxu0  ;;  %v2697_v25 = vpop.f32.mrb[43].mxu1 }
 0x77c   :  { %v3388_v27 = vmul.f32 -1.442695, %v2700_v20  ;;  %v3389_v29 = vmul.f32 -1.442695, %v2702_v21 }
 0x77d   :  { %3681 = vpow2.f32 %v3387_v22 }
 0x77e   :  { %3683 = vpow2.f32 %v3388_v27 }
 0x77f   :  { %3685 = vpow2.f32 %v3389_v29 }
 0x780   :  { %3687 = vtanh.f32 %v2701_v15 }
 0x787   :  { %v3682_v8 = vpop.eup %3681 }
 0x788   :  { %v3684_v30 = vpop.eup %3683  ;;  %v2706_v12 = vadd.f32 1.0, %v3682_v8 }
 0x789   :  { %v2712_v28 = vadd.f32 1.0, %v3684_v30  ;;  %v3686_v62 = vpop.eup %3685 }
 0x78a   :  { %3689 = vrcp.f32 %v2706_v12  ;;  %v3688_v23 = vpop.eup %3687  ;;  %v2719_v7 = vadd.f32 1.0, %v3686_v62 }
 0x78b   :  { %3691 = vrcp.f32 %v2712_v28 }
 0x78c   :  { %3693 = vrcp.f32 %v2719_v7 }
 0x794   :  { %v3690_v44 = vpop.eup %3689 }
 0x795   :  { %v3692_v11 = vpop.eup %3691  ;;  %v2723_v31 = vmul.f32 %v3690_v44, %v3688_v23 }
 0x796   :  { %v2722_v9 = vmul.f32 %v3692_v11, %v4495_v45  ;;  %v3694_v3 = vpop.eup %3693 }
 0x798   :  { %v2724_v36 = vadd.f32 %v2723_v31, %v2722_v9 }
 0x79a   :  { %3695 = vtanh.f32 %v2724_v36 }
 0x7a4   :  { %v3696_v49 = vpop.eup %3695 }
 0x7a5   :  { %v2726_v50 = vmul.f32 %v3696_v49, %v3694_v3 }
 0x7a7   :  { %v2729_v51 = vpack.c.bf16 %v2726_v50, %v2726_v50 }
 0x7a9   :  { %2731 = vst [vmem:[#allocation13 + $0x18] sm:$0xf] %v2729_v51  ;;  %2967 = vmatmul.mubr.bf16.vlgmr.msra.gmra.mrb[44].mxu0 %v2729_v51  ;;  %3008 = vmatmul.mubr.bf16.vlgmr.msra.gmra.mrb[44].mxu1 %v2729_v51 }
 0x87c   :  { %v2968_v52 = vpop.f32.mrb[44].mxu0  ;;  %v3009_v54 = vpop.f32.mrb[44].mxu1 }
 0x87d   :  { %v3016_v56 = vadd.f32 %v2968_v52, %v4642_v55  ;;  %v3018_v58 = vadd.f32 %v3009_v54, %v4643_v57  ;;  %v2970_v59 = vpop.f32.mrb[45].mxu0  ;;  %v3011_v60 = vpop.f32.mrb[45].mxu1 }
 0x87e   :  { %v3017_v63 = vadd.f32 %v2970_v59, %v4644_v61  ;;  %v3019_v6 = vadd.f32 %v3011_v60, %v4645_v1  ;;  %v2972_v26 = vpop.f32.mrb[46].mxu0  ;;  %v3013_v2 = vpop.f32.mrb[46].mxu1 }
 0x87f   :  { %v3422_v4 = vmul.f32 -1.442695, %v3016_v56  ;;  %v2973_v5 = vpop.f32.mrb[47].mxu0  ;;  %v3014_v35 = vpop.f32.mrb[47].mxu1 }
 0x880   :  { %v3423_v53 = vmul.f32 -1.442695, %v3017_v63  ;;  %v3424_v38 = vmul.f32 -1.442695, %v3019_v6 }
 0x881   :  { %3697 = vpow2.f32 %v3422_v4 }
 0x882   :  { %3699 = vpow2.f32 %v3423_v53 }
 0x883   :  { %3701 = vpow2.f32 %v3424_v38 }
 0x884   :  { %3703 = vtanh.f32 %v3018_v58 }
 0x88b   :  { %v3698_v39 = vpop.eup %3697 }
 0x88c   :  { %v3700_v40 = vpop.eup %3699  ;;  %v3023_v41 = vadd.f32 1.0, %v3698_v39 }
 0x88d   :  { %v3029_v42 = vadd.f32 1.0, %v3700_v40  ;;  %v3702_v43 = vpop.eup %3701 }
 0x88e   :  { %3705 = vrcp.f32 %v3023_v41  ;;  %v3704_v45 = vpop.eup %3703  ;;  %v3036_v48 = vadd.f32 1.0, %v3702_v43 }
 0x88f   :  { %3707 = vrcp.f32 %v3029_v42 }
 0x890   :  { %3709 = vrcp.f32 %v3036_v48 }
 0x898   :  { %v3706_v46 = vpop.eup %3705 }
 0x899   :  { %v3708_v37 = vpop.eup %3707  ;;  %v3040_v47 = vmul.f32 %v3706_v46, %v3704_v45 }
 0x89a   :  { %v3039_v14 = vmul.f32 %v3708_v37, %v2724_v36  ;;  %v3710_v24 = vpop.eup %3709 }
 0x89c   :  { %v3041_v13 = vadd.f32 %v3040_v47, %v3039_v14 }
 0x89e   :  { %3711 = vtanh.f32 %v3041_v13  ;;  %3055 = vst [vmem:[#allocation16] sm:$0xff] %v3041_v13 }
 0x8a8   :  { %v3712_v32 = vpop.eup %3711 }
 0x8a9   :  { %v3043_v16 = vmul.f32 %v3712_v32, %v3710_v24 }
 0x8ab   :  { %v3046_v15 = vpack.c.bf16 %v3043_v16, %v3043_v16  ;;  %3053 = vst [vmem:[#allocation14] sm:$0xff] %v3043_v16 }
 0x8ac   :  { %3812 = shalt.err (!%p3809_p8)
}
 0x8ad   :  { %s3813_s0 = scalar_lea.hbm %s4599_s7, 128 }
 0x8ae   :  { %p3814_p9 = scmp.ne.s32.totalorder %s4599_s7, %s3813_s0  ;;  %p3817_p10 = scmp.lt.u32.totalorder %s3813_s0, %s4599_s7 }
 0x8b0   :  { %p3819_p11 = pnand %p3817_p10, %p3814_p9 }
 0x8b2   :  { %3822 = shalt.err (!%p3819_p11)
}
 0x8b3   :  { %3077 = dma.vmem_to_hbm [thread:$0]  %s3075_s13, 128, %s4599_s7, [#allocation15]   ;;  %3048 = vst [vmem:[#allocation13 + $0x1c] sm:$0xf] %v3046_v15 }
 0x8b4   :  { %s3823_s30 = scalar_lea.vmem %s4539_s17, 128  ;;  %p3828_p13 = scmp.lt.s32.totalorder %s4539_s17, %s4539_s17 }
 0x8b5   :  { %p3824_p12 = scmp.ne.s32.totalorder %s4539_s17, %s3823_s30  ;;  %p3829_p0 = scmp.lt.s32.totalorder %s3823_s30, %s3823_s30 }
 0x8b7   :  { %p3830_p1 = por %p3829_p0, %p3828_p13 }
 0x8b9   :  { %p3831_p2 = pnand %p3830_p1, %p3824_p12 }
 0x8bb   :  { %3834 = shalt.err (!%p3831_p2)
}
 0x8bc   :  { %s3835_s12 = scalar_lea.hbm %s4600_s8, 128 }
 0x8bd   :  { %p3836_p3 = scmp.ne.s32.totalorder %s4600_s8, %s3835_s12  ;;  %p3839_p4 = scmp.lt.u32.totalorder %s3835_s12, %s4600_s8 }
 0x8bf   :  { %p3841_p5 = pnand %p3839_p4, %p3836_p3 }
 0x8c1   :  { %3844 = shalt.err (!%p3841_p5)
}
 0x8c2   :  { %3087 = dma.vmem_to_hbm [thread:$0]  %s4539_s17, 128, %s4600_s8, [#allocation15]  }
 0x8c3   :  { %s3845_s11 = scalar_lea.vmem %s4541_s19, 512  ;;  %p3850_p7 = scmp.lt.s32.totalorder %s4541_s19, %s4541_s19 }
 0x8c4   :  { %p3846_p6 = scmp.ne.s32.totalorder %s4541_s19, %s3845_s11  ;;  %p3851_p8 = scmp.lt.s32.totalorder %s3845_s11, %s3845_s11 }
 0x8c6   :  { %p3852_p9 = por %p3851_p8, %p3850_p7 }
 0x8c8   :  { %p3853_p10 = pnand %p3852_p9, %p3846_p6 }
 0x8ca   :  { %3856 = shalt.err (!%p3853_p10)
}
 0x8cb   :  { %s3857_s14 = scalar_lea.hbm %s4598_s6, 512 }
 0x8cc   :  { %p3858_p11 = scmp.ne.s32.totalorder %s4598_s6, %s3857_s14  ;;  %p3861_p12 = scmp.lt.u32.totalorder %s3857_s14, %s4598_s6 }
 0x8ce   :  { %p3863_p13 = pnand %p3861_p12, %p3858_p11 }
 0x8d0   :  { %3866 = shalt.err (!%p3863_p13)
}
 0x8d1   :  { %3067 = dma.vmem_to_hbm [thread:$0]  %s4541_s19, 512, %s4598_s6, [#allocation7], %s3881_s1, %s3881_s1, %s3882_s28  }
 0x8d2   :  { %3873 = dma.done.wait [#allocation7], 512  }
 0x8d3   :  { %3874 = vsyncadd [#allocation7], 4294966784 }
 0x8d4   :  { %3875 = dma.done.wait [#allocation15], 256  }
 0x8d5   :  { %3876 = vsyncadd [#allocation15], 4294967040 }
 0x8d6   :  { %3097 = vsyncpa [#allocation6], 1 }
 0x8d7   :  { %3098 = vsyncpa [#allocation9], 1 }
 0x8d8   :  { %3099 = vsyncpa [#allocation12], 1 }
 0x8d9   :  { %3100 = vsyncpa [#allocation7], 1 }
 0x8da   :  { %3101 = vsyncpa [#allocation15], 1 }

</bundles_post_ra>
